<compile_context>
chip_gen: v6e
topology: v6e:2x2x1
jax: 0.10.0
libtpu: 0.0.40
codegen_flags: <defaults>
</compile_context>

<pallas_src>
import functools
import math

import jax
import jax.numpy as jnp
from jax.experimental import pallas as pl
from jax.experimental.pallas import tpu as pltpu

_INV_SQRT2 = 0.7071067811865476
_HI = jax.lax.Precision.HIGHEST


# ----------------------------------------------------------------------------
# In-kernel helpers
# ----------------------------------------------------------------------------
def _dot(a, b):
    return jnp.dot(a, b, preferred_element_type=jnp.float32)


def _inorm_gelu(y, axis):
    """InstanceNorm (biased var, eps=1e-5, no affine) over `axis`, then exact GELU."""
    n = y.shape[axis]
    s1 = jnp.sum(y, axis=axis, keepdims=True)
    s2 = jnp.sum(y * y, axis=axis, keepdims=True)       # single pass: E[x^2]-mean^2
    mean = s1 * (1.0 / n)
    var = jnp.maximum(s2 * (1.0 / n) - mean * mean, 0.0)
    yn = (y - mean) * jax.lax.rsqrt(var + 1e-5)
    return 0.5 * yn * (1.0 + jax.lax.erf(yn * _INV_SQRT2))


def _encode(x, a_ref, ws_ref, bs_ref, wt_ref, bt_ref):
    """inputs -> (x - x[0]) -> moving-avg decomposition (as a matmul) ->
    seasonal/trend Linear + InstanceNorm + GELU -> sum.  x: [T, C] -> [T, H]."""
    xc = x - x[0:1, :]                         # subtract first timestep
    trend = _dot(a_ref[...], xc)               # replicate-padded moving average
    seasonal = xc - trend
    ys = _dot(seasonal, ws_ref[...]) + bs_ref[...]
    yt = _dot(trend, wt_ref[...]) + bt_ref[...]
    return _inorm_gelu(ys, -1) + _inorm_gelu(yt, -1)


# ----------------------------------------------------------------------------
# Fused forward kernel (one batch element per grid step)
# ----------------------------------------------------------------------------
def _basic_kernel(xl_ref, xs_ref, g_ref, al_ref, as_ref,
                  ws_ref, bs_ref, wt_ref, bt_ref,
                  whd1_ref, bhd1_ref, wlb1t_ref, blb1_ref,
                  whd2_ref, bhd2_ref, wlb2t_ref, blb2_ref,
                  whd3_ref, bhd3_ref, wlb3t_ref, blb3_ref,
                  wreg_ref, breg_ref, proto_ref, out_ref):
    # ---- encoders -----------------------------------------------------------
    enc_l = _encode(xl_ref[...], al_ref, ws_ref, bs_ref, wt_ref, bt_ref)  # [Ll, H]
    enc_s = _encode(xs_ref[...], as_ref, ws_ref, bs_ref, wt_ref, bt_ref)  # [Ls, H]

    # ---- regime encoder -----------------------------------------------------
    # hd* layers: Linear over H, InstanceNorm over H (last dim) per row.
    # lb* layers: pre-transposed weight applied from the LEFT (contracts the
    # lookback axis), InstanceNorm over the new lookback axis (axis 0) per
    # hidden column -> no transposes needed anywhere.
    h = _inorm_gelu(_dot(enc_l, whd1_ref[...]) + bhd1_ref[...], -1)  # [Ll,   H]
    h = _inorm_gelu(_dot(wlb1t_ref[...], h) + blb1_ref[...], 0)      # [Ll/2, H]
    h = _inorm_gelu(_dot(h, whd2_ref[...]) + bhd2_ref[...], -1)      # [Ll/2, H]
    h = _inorm_gelu(_dot(wlb2t_ref[...], h) + blb2_ref[...], 0)      # [Ll/4, H]
    h = _inorm_gelu(_dot(h, whd3_ref[...]) + bhd3_ref[...], -1)      # [Ll/4, H]
    h = _inorm_gelu(_dot(wlb3t_ref[...], h) + blb3_ref[...], 0)      # [Ll/8, H]

    # to_regime: flatten order is (lookback, hidden) == sum of row-slice dots.
    logits = breg_ref[...]                                           # [1, R]
    for l in range(h.shape[0]):                                      # static (Ll/8)
        logits = logits + _dot(h[l:l + 1, :], wreg_ref[l])

    # ---- gumbel_softmax(tau=1, hard=True): forward value == one-hot argmax --
    scores = logits + g_ref[...]                                     # [1, R]
    n_regime = scores.shape[-1]
    mx = jnp.max(scores, axis=-1, keepdims=True)
    iota = jax.lax.broadcasted_iota(jnp.int32, scores.shape, 1)
    idx = jnp.min(jnp.where(scores >= mx, iota, n_regime),
                  axis=-1, keepdims=True)                            # first argmax
    onehot = (iota == idx).astype(jnp.float32)                       # [1, R]

    # ---- prototype head -----------------------------------------------------
    # One wide [1,H] @ [H, R*M*3] matmul per short-term lookback row, then the
    # hard one-hot picks its regime group on the VPU; softmax over M*3.
    mo = out_ref.shape[-1]
    out_all = jnp.zeros((1, n_regime * mo), jnp.float32)
    for n in range(enc_s.shape[0]):                                  # static (Ls)
        out_all = out_all + _dot(enc_s[n:n + 1, :], proto_ref[n])
    sel = jnp.zeros((1, mo), jnp.float32)
    for r in range(n_regime):                                        # static (R)
        sel = sel + onehot[:, r:r + 1] * out_all[:, r * mo:(r + 1) * mo]
    m = jnp.max(sel, axis=-1, keepdims=True)
    e = jnp.exp(sel - m)
    out_ref[...] = e / jnp.sum(e, axis=-1, keepdims=True)


# ----------------------------------------------------------------------------
# Host wrapper
# ----------------------------------------------------------------------------
def _full_spec(shape):
    nd = len(shape)
    return pl.BlockSpec(shape, lambda i, _nd=nd: (0,) * _nd)


def _moving_avg_matrix(t, k):
    """[t,t] matrix A with (A @ x)[i] = mean_j x[clip(i + j - (k-1)//2, 0, t-1)]."""
    p = (k - 1) // 2
    idx = jnp.clip(jnp.arange(t)[:, None] + jnp.arange(k)[None, :] - p, 0, t - 1)
    return jnp.sum(jax.nn.one_hot(idx, t, dtype=jnp.float32), axis=1) / float(k)


@functools.partial(jax.jit, static_argnums=(4,))
def basic_forward(params, x_long, x_short, gumbel_noise, ma_kernel):
    assert ma_kernel % 2 == 1
    # TODO(synk): even moving-average kernel sizes change the sequence length in
    # the PyTorch module; only the (usual) odd case is implemented.
    b, ll, c = x_long.shape
    _, ls, _ = x_short.shape
    ws, bs = params["seasonal"]
    wt, bt = params["trend"]
    hdim = ws.shape[1]
    whd1, bhd1 = params["hd1"]
    wlb1, blb1 = params["lb1"]
    whd2, bhd2 = params["hd2"]
    wlb2, blb2 = params["lb2"]
    whd3, bhd3 = params["hd3"]
    wlb3, blb3 = params["lb3"]
    wreg, breg = params["to_regime"]
    proto = params["prototypes"]                         # [R, Ls, H, M, 3]
    r, _, _, m, o = proto.shape
    mo = m * o

    a_l = _moving_avg_matrix(ll, ma_kernel)
    a_s = _moving_avg_matrix(ls, ma_kernel)
    proto_n = jnp.transpose(proto, (1, 2, 0, 3, 4)).reshape(ls, hdim, r * mo)

    operands = (
        x_long, x_short, gumbel_noise.reshape(b, 1, r), a_l, a_s,
        ws, bs.reshape(1, hdim), wt, bt.reshape(1, hdim),
        whd1, bhd1.reshape(1, hdim), wlb1.T, blb1.reshape(ll // 2, 1),
        whd2, bhd2.reshape(1, hdim), wlb2.T, blb2.reshape(ll // 4, 1),
        whd3, bhd3.reshape(1, hdim), wlb3.T, blb3.reshape(ll // 8, 1),
        wreg.reshape(ll // 8, hdim, r), breg.reshape(1, r), proto_n,
    )

    in_specs = [
        pl.BlockSpec((None, ll, c), lambda i: (i, 0, 0)),
        pl.BlockSpec((None, ls, c), lambda i: (i, 0, 0)),
        pl.BlockSpec((None, 1, r), lambda i: (i, 0, 0)),
    ] + [_full_spec(op.shape) for op in operands[3:]]

    out = pl.pallas_call(
        _basic_kernel,
        grid=(b,),
        in_specs=in_specs,
        out_specs=pl.BlockSpec((None, 1, mo), lambda i: (i, 0, 0)),
        out_shape=jax.ShapeDtypeStruct((b, 1, mo), jnp.float32),
        compiler_params=pltpu.CompilerParams(
            dimension_semantics=("parallel",)),
    )(*operands)
    return out.reshape(b, m, o)


# ----------------------------------------------------------------------------
# Parameter init (nn.Linear-style uniform init; [in, out] weight layout)
# ----------------------------------------------------------------------------
def init_params(key, input_ch, hidden_dim, l_long, l_short, lookahead, regime_num):
    c = input_ch + 1
    keys = iter(jax.random.split(key, 16))

    def linear_params(k, fan_in, fan_out):
        k1, k2 = jax.random.split(k)
        bound = 1.0 / math.sqrt(fan_in)
        w = jax.random.uniform(k1, (fan_in, fan_out), jnp.float32, -bound, bound)
        b = jax.random.uniform(k2, (fan_out,), jnp.float32, -bound, bound)
        return w, b

    p = {}
    p["seasonal"] = linear_params(next(keys), c, hidden_dim)
    p["trend"] = linear_params(next(keys), c, hidden_dim)
    p["hd1"] = linear_params(next(keys), hidden_dim, hidden_dim)
    p["lb1"] = linear_params(next(keys), l_long, l_long // 2)
    p["hd2"] = linear_params(next(keys), hidden_dim, hidden_dim)
    p["lb2"] = linear_params(next(keys), l_long // 2, l_long // 4)
    p["hd3"] = linear_params(next(keys), hidden_dim, hidden_dim)
    p["lb3"] = linear_params(next(keys), l_long // 4, l_long // 8)
    p["to_regime"] = linear_params(next(keys), hidden_dim * l_long // 8, regime_num)
    p["prototypes"] = jax.random.normal(
        next(keys), (regime_num, l_short, hidden_dim, lookahead, 3), jnp.float32)
    return p


# ----------------------------------------------------------------------------
# Pure-JAX reference (mirrors the PyTorch module, inference mode) for checking
# ----------------------------------------------------------------------------
def _ref_forward(params, x_long, x_short, gumbel_noise, ma_kernel):
    def inorm(y, axis):
        mean = jnp.mean(y, axis=axis, keepdims=True)
        var = jnp.mean((y - mean) ** 2, axis=axis, keepdims=True)
        return (y - mean) / jnp.sqrt(var + 1e-5)

    def gelu(x):
        return 0.5 * x * (1.0 + jax.lax.erf(x * _INV_SQRT2))

    def moving_avg(x, k):
        p = (k - 1) // 2
        xp = jnp.concatenate(
            [jnp.repeat(x[:, :1, :], p, axis=1), x,
             jnp.repeat(x[:, -1:, :], p, axis=1)], axis=1)
        t = x.shape[1]
        return jnp.mean(jnp.stack([xp[:, j:j + t, :] for j in range(k)], 0), axis=0)

    def encode(x):
        x = x - x[:, :1, :]
        trend = moving_avg(x, ma_kernel)
        seasonal = x - trend
        ws, bs = params["seasonal"]
        wt, bt = params["trend"]
        s = gelu(inorm(jnp.matmul(seasonal, ws, precision=_HI) + bs, -1))
        t = gelu(inorm(jnp.matmul(trend, wt, precision=_HI) + bt, -1))
        return s + t

    def hd(x, name):
        w, bb = params[name]
        return gelu(inorm(jnp.matmul(x, w, precision=_HI) + bb, -1))

    def lb(x, name):
        w, bb = params[name]
        y = jnp.matmul(jnp.transpose(x, (0, 2, 1)), w, precision=_HI) + bb
        return jnp.transpose(gelu(inorm(y, -1)), (0, 2, 1))

    enc_l = encode(x_long)
    enc_s = encode(x_short)
    z = hd(enc_l, "hd1"); z = lb(z, "lb1")
    z = hd(z, "hd2");     z = lb(z, "lb2")
    z = hd(z, "hd3");     z = lb(z, "lb3")
    w, bb = params["to_regime"]
    logits = jnp.matmul(z.reshape(z.shape[0], -1), w, precision=_HI) + bb
    hard = jax.nn.one_hot(jnp.argmax(logits + gumbel_noise, -1),
                          logits.shape[-1], dtype=jnp.float32)
    sel = jnp.einsum('br,rnhmo->bnhmo', hard, params["prototypes"], precision=_HI)
    out = jnp.einsum('bnh,bnhmo->bmo', enc_s, sel, precision=_HI)
    bsz = out.shape[0]
    return jax.nn.softmax(out.reshape(bsz, -1), -1).reshape(out.shape)


# ----------------------------------------------------------------------------
if __name__ == "__main__":
    B = 2
    input_ch = 3            # module internally uses input_ch + 1 = 4 channels
    hidden_dim = 32
    lookback_long = 16
    lookback_short = 8
    lookahead = 4
    regime_num = 5
    ma_kernel = 5

    root = jax.random.PRNGKey(0)
    k_params, k_long, k_short, k_gumbel = jax.random.split(root, 4)

    params = init_params(k_params, input_ch, hidden_dim, lookback_long,
                         lookback_short, lookahead, regime_num)
    inputs_longterm = jax.random.normal(
        k_long, (B, lookback_long, input_ch + 1), jnp.float32)
    inputs_shortterm = jax.random.normal(
        k_short, (B, lookback_short, input_ch + 1), jnp.float32)
    gumbel_noise = jax.random.gumbel(k_gumbel, (B, regime_num), jnp.float32)

    out = basic_forward(params, inputs_longterm, inputs_shortterm,
                        gumbel_noise, ma_kernel)
    out = jax.block_until_ready(out)

    assert out.shape == (B, lookahead, 3), out.shape
    assert bool(jnp.all(jnp.isfinite(out)))
    sums = jnp.sum(out.reshape(B, -1), axis=-1)
    assert bool(jnp.all(jnp.abs(sums - 1.0) < 1e-4)), sums

    # cross-check against a pure-JAX mirror of the PyTorch forward pass
    ref = _ref_forward(params, inputs_longterm, inputs_shortterm,
                       gumbel_noise, ma_kernel)
    err = float(jnp.max(jnp.abs(out - ref)))
    assert err < 2e-3, err
    print("KERNEL_OK")
</pallas_src>

<mosaic_0001>
module attributes {stable_mosaic.version = 11 : i64} {
  func.func @_basic_kernel(%arg0: i32, %arg1: memref<1x16x4xf32, #tpu.memory_space<vmem>>, %arg2: memref<1x8x4xf32, #tpu.memory_space<vmem>>, %arg3: memref<1x1x5xf32, #tpu.memory_space<vmem>>, %arg4: memref<16x16xf32, #tpu.memory_space<vmem>>, %arg5: memref<8x8xf32, #tpu.memory_space<vmem>>, %arg6: memref<4x32xf32, #tpu.memory_space<vmem>>, %arg7: memref<1x32xf32, #tpu.memory_space<vmem>>, %arg8: memref<4x32xf32, #tpu.memory_space<vmem>>, %arg9: memref<1x32xf32, #tpu.memory_space<vmem>>, %arg10: memref<32x32xf32, #tpu.memory_space<vmem>>, %arg11: memref<1x32xf32, #tpu.memory_space<vmem>>, %arg12: memref<8x16xf32, #tpu.memory_space<vmem>>, %arg13: memref<8x1xf32, #tpu.memory_space<vmem>>, %arg14: memref<32x32xf32, #tpu.memory_space<vmem>>, %arg15: memref<1x32xf32, #tpu.memory_space<vmem>>, %arg16: memref<4x8xf32, #tpu.memory_space<vmem>>, %arg17: memref<4x1xf32, #tpu.memory_space<vmem>>, %arg18: memref<32x32xf32, #tpu.memory_space<vmem>>, %arg19: memref<1x32xf32, #tpu.memory_space<vmem>>, %arg20: memref<2x4xf32, #tpu.memory_space<vmem>>, %arg21: memref<2x1xf32, #tpu.memory_space<vmem>>, %arg22: memref<2x32x5xf32, #tpu.memory_space<vmem>>, %arg23: memref<1x5xf32, #tpu.memory_space<vmem>>, %arg24: memref<8x32x60xf32, #tpu.memory_space<vmem>>, %arg25: memref<1x1x12xf32, #tpu.memory_space<vmem>>) attributes {dimension_semantics = [#tpu.dimension_semantics<parallel>], iteration_bounds = array<i64: 2>, scalar_prefetch = 0 : i64, scratch_operands = 0 : i64, tpu.core_type = #tpu.core_type<tc>, window_params = [{transform_indices = @transform_0, window_bounds = array<i64: 1, 16, 4>}, {transform_indices = @transform_1, window_bounds = array<i64: 1, 8, 4>}, {transform_indices = @transform_2, window_bounds = array<i64: 1, 1, 5>}, {pipeline_mode = #tpu.pipeline_mode<synchronous>, transform_indices = @transform_3, window_bounds = array<i64: 16, 16>}, {pipeline_mode = #tpu.pipeline_mode<synchronous>, transform_indices = @transform_4, window_bounds = array<i64: 8, 8>}, {pipeline_mode = #tpu.pipeline_mode<synchronous>, transform_indices = @transform_5, window_bounds = array<i64: 4, 32>}, {pipeline_mode = #tpu.pipeline_mode<synchronous>, transform_indices = @transform_6, window_bounds = array<i64: 1, 32>}, {pipeline_mode = #tpu.pipeline_mode<synchronous>, transform_indices = @transform_7, window_bounds = array<i64: 4, 32>}, {pipeline_mode = #tpu.pipeline_mode<synchronous>, transform_indices = @transform_8, window_bounds = array<i64: 1, 32>}, {pipeline_mode = #tpu.pipeline_mode<synchronous>, transform_indices = @transform_9, window_bounds = array<i64: 32, 32>}, {pipeline_mode = #tpu.pipeline_mode<synchronous>, transform_indices = @transform_10, window_bounds = array<i64: 1, 32>}, {pipeline_mode = #tpu.pipeline_mode<synchronous>, transform_indices = @transform_11, window_bounds = array<i64: 8, 16>}, {pipeline_mode = #tpu.pipeline_mode<synchronous>, transform_indices = @transform_12, window_bounds = array<i64: 8, 1>}, {pipeline_mode = #tpu.pipeline_mode<synchronous>, transform_indices = @transform_13, window_bounds = array<i64: 32, 32>}, {pipeline_mode = #tpu.pipeline_mode<synchronous>, transform_indices = @transform_14, window_bounds = array<i64: 1, 32>}, {pipeline_mode = #tpu.pipeline_mode<synchronous>, transform_indices = @transform_15, window_bounds = array<i64: 4, 8>}, {pipeline_mode = #tpu.pipeline_mode<synchronous>, transform_indices = @transform_16, window_bounds = array<i64: 4, 1>}, {pipeline_mode = #tpu.pipeline_mode<synchronous>, transform_indices = @transform_17, window_bounds = array<i64: 32, 32>}, {pipeline_mode = #tpu.pipeline_mode<synchronous>, transform_indices = @transform_18, window_bounds = array<i64: 1, 32>}, {pipeline_mode = #tpu.pipeline_mode<synchronous>, transform_indices = @transform_19, window_bounds = array<i64: 2, 4>}, {pipeline_mode = #tpu.pipeline_mode<synchronous>, transform_indices = @transform_20, window_bounds = array<i64: 2, 1>}, {pipeline_mode = #tpu.pipeline_mode<synchronous>, transform_indices = @transform_21, window_bounds = array<i64: 2, 32, 5>}, {pipeline_mode = #tpu.pipeline_mode<synchronous>, transform_indices = @transform_22, window_bounds = array<i64: 1, 5>}, {pipeline_mode = #tpu.pipeline_mode<synchronous>, transform_indices = @transform_23, window_bounds = array<i64: 8, 32, 60>}, {transform_indices = @transform_24, window_bounds = array<i64: 1, 1, 12>}]} {
    %c0 = arith.constant 0 : index
    %c0_0 = arith.constant 0 : index
    %c0_1 = arith.constant 0 : index
    %0 = vector.load %arg1[%c0, %c0_0, %c0_1] : memref<1x16x4xf32, #tpu.memory_space<vmem>>, vector<1x16x4xf32>
    %1 = vector.shape_cast %0 : vector<1x16x4xf32> to vector<16x4xf32>
    %2 = vector.extract_strided_slice %1 {offsets = [0, 0], sizes = [1, 4], strides = [1, 1]} : vector<16x4xf32> to vector<1x4xf32>
    %3 = vector.broadcast %2 : vector<1x4xf32> to vector<16x4xf32>
    %4 = arith.subf %1, %3 : vector<16x4xf32>
    %c0_2 = arith.constant 0 : index
    %c0_3 = arith.constant 0 : index
    %5 = vector.load %arg4[%c0_2, %c0_3] : memref<16x16xf32, #tpu.memory_space<vmem>>, vector<16x16xf32>
    %cst = arith.constant dense<0.000000e+00> : vector<16x4xf32>
    %6 = tpu.matmul %5, %4, %cst {dimension_numbers = #tpu.dot_dimension_numbers<[1], [0], [0], [1], [0, 0, 1, 1], [], []>} : vector<16x16xf32>, vector<16x4xf32>, vector<16x4xf32> -> vector<16x4xf32>
    %7 = arith.subf %4, %6 : vector<16x4xf32>
    %c0_4 = arith.constant 0 : index
    %c0_5 = arith.constant 0 : index
    %8 = vector.load %arg6[%c0_4, %c0_5] : memref<4x32xf32, #tpu.memory_space<vmem>>, vector<4x32xf32>
    %cst_6 = arith.constant dense<0.000000e+00> : vector<16x32xf32>
    %9 = tpu.matmul %7, %8, %cst_6 {dimension_numbers = #tpu.dot_dimension_numbers<[1], [0], [0], [1], [0, 0, 1, 1], [], []>} : vector<16x4xf32>, vector<4x32xf32>, vector<16x32xf32> -> vector<16x32xf32>
    %c0_7 = arith.constant 0 : index
    %c0_8 = arith.constant 0 : index
    %10 = vector.load %arg7[%c0_7, %c0_8] : memref<1x32xf32, #tpu.memory_space<vmem>>, vector<1x32xf32>
    %11 = vector.broadcast %10 : vector<1x32xf32> to vector<16x32xf32>
    %12 = arith.addf %9, %11 : vector<16x32xf32>
    %c0_9 = arith.constant 0 : index
    %c0_10 = arith.constant 0 : index
    %13 = vector.load %arg8[%c0_9, %c0_10] : memref<4x32xf32, #tpu.memory_space<vmem>>, vector<4x32xf32>
    %cst_11 = arith.constant dense<0.000000e+00> : vector<16x32xf32>
    %14 = tpu.matmul %6, %13, %cst_11 {dimension_numbers = #tpu.dot_dimension_numbers<[1], [0], [0], [1], [0, 0, 1, 1], [], []>} : vector<16x4xf32>, vector<4x32xf32>, vector<16x32xf32> -> vector<16x32xf32>
    %c0_12 = arith.constant 0 : index
    %c0_13 = arith.constant 0 : index
    %15 = vector.load %arg9[%c0_12, %c0_13] : memref<1x32xf32, #tpu.memory_space<vmem>>, vector<1x32xf32>
    %16 = vector.broadcast %15 : vector<1x32xf32> to vector<16x32xf32>
    %17 = arith.addf %14, %16 : vector<16x32xf32>
    %cst_14 = arith.constant dense<0.000000e+00> : vector<16xf32>
    %18 = vector.multi_reduction <add>, %12, %cst_14 [1] : vector<16x32xf32> to vector<16xf32>
    %19 = vector.shape_cast %18 : vector<16xf32> to vector<16x1xf32>
    %20 = arith.mulf %12, %12 : vector<16x32xf32>
    %cst_15 = arith.constant dense<0.000000e+00> : vector<16xf32>
    %21 = vector.multi_reduction <add>, %20, %cst_15 [1] : vector<16x32xf32> to vector<16xf32>
    %22 = vector.shape_cast %21 : vector<16xf32> to vector<16x1xf32>
    %cst_16 = arith.constant 3.125000e-02 : f32
    %23 = vector.broadcast %cst_16 : f32 to vector<16x1xf32>
    %24 = arith.mulf %19, %23 : vector<16x1xf32>
    %cst_17 = arith.constant 3.125000e-02 : f32
    %25 = vector.broadcast %cst_17 : f32 to vector<16x1xf32>
    %26 = arith.mulf %22, %25 : vector<16x1xf32>
    %27 = arith.mulf %24, %24 : vector<16x1xf32>
    %28 = arith.subf %26, %27 : vector<16x1xf32>
    %cst_18 = arith.constant 0.000000e+00 : f32
    %29 = vector.broadcast %cst_18 : f32 to vector<16x1xf32>
    %30 = arith.maximumf %28, %29 : vector<16x1xf32>
    %31 = vector.broadcast %24 : vector<16x1xf32> to vector<16x32xf32>
    %32 = arith.subf %12, %31 : vector<16x32xf32>
    %cst_19 = arith.constant 9.99999974E-6 : f32
    %33 = vector.broadcast %cst_19 : f32 to vector<16x1xf32>
    %34 = arith.addf %30, %33 : vector<16x1xf32>
    %35 = math.rsqrt %34 : vector<16x1xf32>
    %36 = vector.broadcast %35 : vector<16x1xf32> to vector<16x32xf32>
    %37 = arith.mulf %32, %36 : vector<16x32xf32>
    %cst_20 = arith.constant 5.000000e-01 : f32
    %38 = vector.broadcast %cst_20 : f32 to vector<16x32xf32>
    %39 = arith.mulf %38, %37 : vector<16x32xf32>
    %cst_21 = arith.constant 0.707106769 : f32
    %40 = vector.broadcast %cst_21 : f32 to vector<16x32xf32>
    %41 = arith.mulf %37, %40 : vector<16x32xf32>
    %42 = math.erf %41 : vector<16x32xf32>
    %cst_22 = arith.constant 1.000000e+00 : f32
    %43 = vector.broadcast %cst_22 : f32 to vector<16x32xf32>
    %44 = arith.addf %43, %42 : vector<16x32xf32>
    %45 = arith.mulf %39, %44 : vector<16x32xf32>
    %cst_23 = arith.constant dense<0.000000e+00> : vector<16xf32>
    %46 = vector.multi_reduction <add>, %17, %cst_23 [1] : vector<16x32xf32> to vector<16xf32>
    %47 = vector.shape_cast %46 : vector<16xf32> to vector<16x1xf32>
    %48 = arith.mulf %17, %17 : vector<16x32xf32>
    %cst_24 = arith.constant dense<0.000000e+00> : vector<16xf32>
    %49 = vector.multi_reduction <add>, %48, %cst_24 [1] : vector<16x32xf32> to vector<16xf32>
    %50 = vector.shape_cast %49 : vector<16xf32> to vector<16x1xf32>
    %cst_25 = arith.constant 3.125000e-02 : f32
    %51 = vector.broadcast %cst_25 : f32 to vector<16x1xf32>
    %52 = arith.mulf %47, %51 : vector<16x1xf32>
    %cst_26 = arith.constant 3.125000e-02 : f32
    %53 = vector.broadcast %cst_26 : f32 to vector<16x1xf32>
    %54 = arith.mulf %50, %53 : vector<16x1xf32>
    %55 = arith.mulf %52, %52 : vector<16x1xf32>
    %56 = arith.subf %54, %55 : vector<16x1xf32>
    %cst_27 = arith.constant 0.000000e+00 : f32
    %57 = vector.broadcast %cst_27 : f32 to vector<16x1xf32>
    %58 = arith.maximumf %56, %57 : vector<16x1xf32>
    %59 = vector.broadcast %52 : vector<16x1xf32> to vector<16x32xf32>
    %60 = arith.subf %17, %59 : vector<16x32xf32>
    %cst_28 = arith.constant 9.99999974E-6 : f32
    %61 = vector.broadcast %cst_28 : f32 to vector<16x1xf32>
    %62 = arith.addf %58, %61 : vector<16x1xf32>
    %63 = math.rsqrt %62 : vector<16x1xf32>
    %64 = vector.broadcast %63 : vector<16x1xf32> to vector<16x32xf32>
    %65 = arith.mulf %60, %64 : vector<16x32xf32>
    %cst_29 = arith.constant 5.000000e-01 : f32
    %66 = vector.broadcast %cst_29 : f32 to vector<16x32xf32>
    %67 = arith.mulf %66, %65 : vector<16x32xf32>
    %cst_30 = arith.constant 0.707106769 : f32
    %68 = vector.broadcast %cst_30 : f32 to vector<16x32xf32>
    %69 = arith.mulf %65, %68 : vector<16x32xf32>
    %70 = math.erf %69 : vector<16x32xf32>
    %cst_31 = arith.constant 1.000000e+00 : f32
    %71 = vector.broadcast %cst_31 : f32 to vector<16x32xf32>
    %72 = arith.addf %71, %70 : vector<16x32xf32>
    %73 = arith.mulf %67, %72 : vector<16x32xf32>
    %74 = arith.addf %45, %73 : vector<16x32xf32>
    %c0_32 = arith.constant 0 : index
    %c0_33 = arith.constant 0 : index
    %c0_34 = arith.constant 0 : index
    %75 = vector.load %arg2[%c0_32, %c0_33, %c0_34] : memref<1x8x4xf32, #tpu.memory_space<vmem>>, vector<1x8x4xf32>
    %76 = vector.shape_cast %75 : vector<1x8x4xf32> to vector<8x4xf32>
    %77 = vector.extract_strided_slice %76 {offsets = [0, 0], sizes = [1, 4], strides = [1, 1]} : vector<8x4xf32> to vector<1x4xf32>
    %78 = vector.broadcast %77 : vector<1x4xf32> to vector<8x4xf32>
    %79 = arith.subf %76, %78 : vector<8x4xf32>
    %c0_35 = arith.constant 0 : index
    %c0_36 = arith.constant 0 : index
    %80 = vector.load %arg5[%c0_35, %c0_36] : memref<8x8xf32, #tpu.memory_space<vmem>>, vector<8x8xf32>
    %cst_37 = arith.constant dense<0.000000e+00> : vector<8x4xf32>
    %81 = tpu.matmul %80, %79, %cst_37 {dimension_numbers = #tpu.dot_dimension_numbers<[1], [0], [0], [1], [0, 0, 1, 1], [], []>} : vector<8x8xf32>, vector<8x4xf32>, vector<8x4xf32> -> vector<8x4xf32>
    %82 = arith.subf %79, %81 : vector<8x4xf32>
    %c0_38 = arith.constant 0 : index
    %c0_39 = arith.constant 0 : index
    %83 = vector.load %arg6[%c0_38, %c0_39] : memref<4x32xf32, #tpu.memory_space<vmem>>, vector<4x32xf32>
    %cst_40 = arith.constant dense<0.000000e+00> : vector<8x32xf32>
    %84 = tpu.matmul %82, %83, %cst_40 {dimension_numbers = #tpu.dot_dimension_numbers<[1], [0], [0], [1], [0, 0, 1, 1], [], []>} : vector<8x4xf32>, vector<4x32xf32>, vector<8x32xf32> -> vector<8x32xf32>
    %c0_41 = arith.constant 0 : index
    %c0_42 = arith.constant 0 : index
    %85 = vector.load %arg7[%c0_41, %c0_42] : memref<1x32xf32, #tpu.memory_space<vmem>>, vector<1x32xf32>
    %86 = vector.broadcast %85 : vector<1x32xf32> to vector<8x32xf32>
    %87 = arith.addf %84, %86 : vector<8x32xf32>
    %c0_43 = arith.constant 0 : index
    %c0_44 = arith.constant 0 : index
    %88 = vector.load %arg8[%c0_43, %c0_44] : memref<4x32xf32, #tpu.memory_space<vmem>>, vector<4x32xf32>
    %cst_45 = arith.constant dense<0.000000e+00> : vector<8x32xf32>
    %89 = tpu.matmul %81, %88, %cst_45 {dimension_numbers = #tpu.dot_dimension_numbers<[1], [0], [0], [1], [0, 0, 1, 1], [], []>} : vector<8x4xf32>, vector<4x32xf32>, vector<8x32xf32> -> vector<8x32xf32>
    %c0_46 = arith.constant 0 : index
    %c0_47 = arith.constant 0 : index
    %90 = vector.load %arg9[%c0_46, %c0_47] : memref<1x32xf32, #tpu.memory_space<vmem>>, vector<1x32xf32>
    %91 = vector.broadcast %90 : vector<1x32xf32> to vector<8x32xf32>
    %92 = arith.addf %89, %91 : vector<8x32xf32>
    %cst_48 = arith.constant dense<0.000000e+00> : vector<8xf32>
    %93 = vector.multi_reduction <add>, %87, %cst_48 [1] : vector<8x32xf32> to vector<8xf32>
    %94 = vector.shape_cast %93 : vector<8xf32> to vector<8x1xf32>
    %95 = arith.mulf %87, %87 : vector<8x32xf32>
    %cst_49 = arith.constant dense<0.000000e+00> : vector<8xf32>
    %96 = vector.multi_reduction <add>, %95, %cst_49 [1] : vector<8x32xf32> to vector<8xf32>
    %97 = vector.shape_cast %96 : vector<8xf32> to vector<8x1xf32>
    %cst_50 = arith.constant 3.125000e-02 : f32
    %98 = vector.broadcast %cst_50 : f32 to vector<8x1xf32>
    %99 = arith.mulf %94, %98 : vector<8x1xf32>
    %cst_51 = arith.constant 3.125000e-02 : f32
    %100 = vector.broadcast %cst_51 : f32 to vector<8x1xf32>
    %101 = arith.mulf %97, %100 : vector<8x1xf32>
    %102 = arith.mulf %99, %99 : vector<8x1xf32>
    %103 = arith.subf %101, %102 : vector<8x1xf32>
    %cst_52 = arith.constant 0.000000e+00 : f32
    %104 = vector.broadcast %cst_52 : f32 to vector<8x1xf32>
    %105 = arith.maximumf %103, %104 : vector<8x1xf32>
    %106 = vector.broadcast %99 : vector<8x1xf32> to vector<8x32xf32>
    %107 = arith.subf %87, %106 : vector<8x32xf32>
    %cst_53 = arith.constant 9.99999974E-6 : f32
    %108 = vector.broadcast %cst_53 : f32 to vector<8x1xf32>
    %109 = arith.addf %105, %108 : vector<8x1xf32>
    %110 = math.rsqrt %109 : vector<8x1xf32>
    %111 = vector.broadcast %110 : vector<8x1xf32> to vector<8x32xf32>
    %112 = arith.mulf %107, %111 : vector<8x32xf32>
    %cst_54 = arith.constant 5.000000e-01 : f32
    %113 = vector.broadcast %cst_54 : f32 to vector<8x32xf32>
    %114 = arith.mulf %113, %112 : vector<8x32xf32>
    %cst_55 = arith.constant 0.707106769 : f32
    %115 = vector.broadcast %cst_55 : f32 to vector<8x32xf32>
    %116 = arith.mulf %112, %115 : vector<8x32xf32>
    %117 = math.erf %116 : vector<8x32xf32>
    %cst_56 = arith.constant 1.000000e+00 : f32
    %118 = vector.broadcast %cst_56 : f32 to vector<8x32xf32>
    %119 = arith.addf %118, %117 : vector<8x32xf32>
    %120 = arith.mulf %114, %119 : vector<8x32xf32>
    %cst_57 = arith.constant dense<0.000000e+00> : vector<8xf32>
    %121 = vector.multi_reduction <add>, %92, %cst_57 [1] : vector<8x32xf32> to vector<8xf32>
    %122 = vector.shape_cast %121 : vector<8xf32> to vector<8x1xf32>
    %123 = arith.mulf %92, %92 : vector<8x32xf32>
    %cst_58 = arith.constant dense<0.000000e+00> : vector<8xf32>
    %124 = vector.multi_reduction <add>, %123, %cst_58 [1] : vector<8x32xf32> to vector<8xf32>
    %125 = vector.shape_cast %124 : vector<8xf32> to vector<8x1xf32>
    %cst_59 = arith.constant 3.125000e-02 : f32
    %126 = vector.broadcast %cst_59 : f32 to vector<8x1xf32>
    %127 = arith.mulf %122, %126 : vector<8x1xf32>
    %cst_60 = arith.constant 3.125000e-02 : f32
    %128 = vector.broadcast %cst_60 : f32 to vector<8x1xf32>
    %129 = arith.mulf %125, %128 : vector<8x1xf32>
    %130 = arith.mulf %127, %127 : vector<8x1xf32>
    %131 = arith.subf %129, %130 : vector<8x1xf32>
    %cst_61 = arith.constant 0.000000e+00 : f32
    %132 = vector.broadcast %cst_61 : f32 to vector<8x1xf32>
    %133 = arith.maximumf %131, %132 : vector<8x1xf32>
    %134 = vector.broadcast %127 : vector<8x1xf32> to vector<8x32xf32>
    %135 = arith.subf %92, %134 : vector<8x32xf32>
    %cst_62 = arith.constant 9.99999974E-6 : f32
    %136 = vector.broadcast %cst_62 : f32 to vector<8x1xf32>
    %137 = arith.addf %133, %136 : vector<8x1xf32>
    %138 = math.rsqrt %137 : vector<8x1xf32>
    %139 = vector.broadcast %138 : vector<8x1xf32> to vector<8x32xf32>
    %140 = arith.mulf %135, %139 : vector<8x32xf32>
    %cst_63 = arith.constant 5.000000e-01 : f32
    %141 = vector.broadcast %cst_63 : f32 to vector<8x32xf32>
    %142 = arith.mulf %141, %140 : vector<8x32xf32>
    %cst_64 = arith.constant 0.707106769 : f32
    %143 = vector.broadcast %cst_64 : f32 to vector<8x32xf32>
    %144 = arith.mulf %140, %143 : vector<8x32xf32>
    %145 = math.erf %144 : vector<8x32xf32>
    %cst_65 = arith.constant 1.000000e+00 : f32
    %146 = vector.broadcast %cst_65 : f32 to vector<8x32xf32>
    %147 = arith.addf %146, %145 : vector<8x32xf32>
    %148 = arith.mulf %142, %147 : vector<8x32xf32>
    %149 = arith.addf %120, %148 : vector<8x32xf32>
    %c0_66 = arith.constant 0 : index
    %c0_67 = arith.constant 0 : index
    %150 = vector.load %arg10[%c0_66, %c0_67] : memref<32x32xf32, #tpu.memory_space<vmem>>, vector<32x32xf32>
    %cst_68 = arith.constant dense<0.000000e+00> : vector<16x32xf32>
    %151 = tpu.matmul %74, %150, %cst_68 {dimension_numbers = #tpu.dot_dimension_numbers<[1], [0], [0], [1], [0, 0, 1, 1], [], []>} : vector<16x32xf32>, vector<32x32xf32>, vector<16x32xf32> -> vector<16x32xf32>
    %c0_69 = arith.constant 0 : index
    %c0_70 = arith.constant 0 : index
    %152 = vector.load %arg11[%c0_69, %c0_70] : memref<1x32xf32, #tpu.memory_space<vmem>>, vector<1x32xf32>
    %153 = vector.broadcast %152 : vector<1x32xf32> to vector<16x32xf32>
    %154 = arith.addf %151, %153 : vector<16x32xf32>
    %cst_71 = arith.constant dense<0.000000e+00> : vector<16xf32>
    %155 = vector.multi_reduction <add>, %154, %cst_71 [1] : vector<16x32xf32> to vector<16xf32>
    %156 = vector.shape_cast %155 : vector<16xf32> to vector<16x1xf32>
    %157 = arith.mulf %154, %154 : vector<16x32xf32>
    %cst_72 = arith.constant dense<0.000000e+00> : vector<16xf32>
    %158 = vector.multi_reduction <add>, %157, %cst_72 [1] : vector<16x32xf32> to vector<16xf32>
    %159 = vector.shape_cast %158 : vector<16xf32> to vector<16x1xf32>
    %cst_73 = arith.constant 3.125000e-02 : f32
    %160 = vector.broadcast %cst_73 : f32 to vector<16x1xf32>
    %161 = arith.mulf %156, %160 : vector<16x1xf32>
    %cst_74 = arith.constant 3.125000e-02 : f32
    %162 = vector.broadcast %cst_74 : f32 to vector<16x1xf32>
    %163 = arith.mulf %159, %162 : vector<16x1xf32>
    %164 = arith.mulf %161, %161 : vector<16x1xf32>
    %165 = arith.subf %163, %164 : vector<16x1xf32>
    %cst_75 = arith.constant 0.000000e+00 : f32
    %166 = vector.broadcast %cst_75 : f32 to vector<16x1xf32>
    %167 = arith.maximumf %165, %166 : vector<16x1xf32>
    %168 = vector.broadcast %161 : vector<16x1xf32> to vector<16x32xf32>
    %169 = arith.subf %154, %168 : vector<16x32xf32>
    %cst_76 = arith.constant 9.99999974E-6 : f32
    %170 = vector.broadcast %cst_76 : f32 to vector<16x1xf32>
    %171 = arith.addf %167, %170 : vector<16x1xf32>
    %172 = math.rsqrt %171 : vector<16x1xf32>
    %173 = vector.broadcast %172 : vector<16x1xf32> to vector<16x32xf32>
    %174 = arith.mulf %169, %173 : vector<16x32xf32>
    %cst_77 = arith.constant 5.000000e-01 : f32
    %175 = vector.broadcast %cst_77 : f32 to vector<16x32xf32>
    %176 = arith.mulf %175, %174 : vector<16x32xf32>
    %cst_78 = arith.constant 0.707106769 : f32
    %177 = vector.broadcast %cst_78 : f32 to vector<16x32xf32>
    %178 = arith.mulf %174, %177 : vector<16x32xf32>
    %179 = math.erf %178 : vector<16x32xf32>
    %cst_79 = arith.constant 1.000000e+00 : f32
    %180 = vector.broadcast %cst_79 : f32 to vector<16x32xf32>
    %181 = arith.addf %180, %179 : vector<16x32xf32>
    %182 = arith.mulf %176, %181 : vector<16x32xf32>
    %c0_80 = arith.constant 0 : index
    %c0_81 = arith.constant 0 : index
    %183 = vector.load %arg12[%c0_80, %c0_81] : memref<8x16xf32, #tpu.memory_space<vmem>>, vector<8x16xf32>
    %cst_82 = arith.constant dense<0.000000e+00> : vector<8x32xf32>
    %184 = tpu.matmul %183, %182, %cst_82 {dimension_numbers = #tpu.dot_dimension_numbers<[1], [0], [0], [1], [0, 0, 1, 1], [], []>} : vector<8x16xf32>, vector<16x32xf32>, vector<8x32xf32> -> vector<8x32xf32>
    %c0_83 = arith.constant 0 : index
    %c0_84 = arith.constant 0 : index
    %185 = vector.load %arg13[%c0_83, %c0_84] : memref<8x1xf32, #tpu.memory_space<vmem>>, vector<8x1xf32>
    %186 = vector.broadcast %185 : vector<8x1xf32> to vector<8x32xf32>
    %187 = arith.addf %184, %186 : vector<8x32xf32>
    %cst_85 = arith.constant dense<0.000000e+00> : vector<32xf32>
    %188 = vector.multi_reduction <add>, %187, %cst_85 [0] : vector<8x32xf32> to vector<32xf32>
    %189 = vector.shape_cast %188 : vector<32xf32> to vector<1x32xf32>
    %190 = arith.mulf %187, %187 : vector<8x32xf32>
    %cst_86 = arith.constant dense<0.000000e+00> : vector<32xf32>
    %191 = vector.multi_reduction <add>, %190, %cst_86 [0] : vector<8x32xf32> to vector<32xf32>
    %192 = vector.shape_cast %191 : vector<32xf32> to vector<1x32xf32>
    %cst_87 = arith.constant 1.250000e-01 : f32
    %193 = vector.broadcast %cst_87 : f32 to vector<1x32xf32>
    %194 = arith.mulf %189, %193 : vector<1x32xf32>
    %cst_88 = arith.constant 1.250000e-01 : f32
    %195 = vector.broadcast %cst_88 : f32 to vector<1x32xf32>
    %196 = arith.mulf %192, %195 : vector<1x32xf32>
    %197 = arith.mulf %194, %194 : vector<1x32xf32>
    %198 = arith.subf %196, %197 : vector<1x32xf32>
    %cst_89 = arith.constant 0.000000e+00 : f32
    %199 = vector.broadcast %cst_89 : f32 to vector<1x32xf32>
    %200 = arith.maximumf %198, %199 : vector<1x32xf32>
    %201 = vector.broadcast %194 : vector<1x32xf32> to vector<8x32xf32>
    %202 = arith.subf %187, %201 : vector<8x32xf32>
    %cst_90 = arith.constant 9.99999974E-6 : f32
    %203 = vector.broadcast %cst_90 : f32 to vector<1x32xf32>
    %204 = arith.addf %200, %203 : vector<1x32xf32>
    %205 = math.rsqrt %204 : vector<1x32xf32>
    %206 = vector.broadcast %205 : vector<1x32xf32> to vector<8x32xf32>
    %207 = arith.mulf %202, %206 : vector<8x32xf32>
    %cst_91 = arith.constant 5.000000e-01 : f32
    %208 = vector.broadcast %cst_91 : f32 to vector<8x32xf32>
    %209 = arith.mulf %208, %207 : vector<8x32xf32>
    %cst_92 = arith.constant 0.707106769 : f32
    %210 = vector.broadcast %cst_92 : f32 to vector<8x32xf32>
    %211 = arith.mulf %207, %210 : vector<8x32xf32>
    %212 = math.erf %211 : vector<8x32xf32>
    %cst_93 = arith.constant 1.000000e+00 : f32
    %213 = vector.broadcast %cst_93 : f32 to vector<8x32xf32>
    %214 = arith.addf %213, %212 : vector<8x32xf32>
    %215 = arith.mulf %209, %214 : vector<8x32xf32>
    %c0_94 = arith.constant 0 : index
    %c0_95 = arith.constant 0 : index
    %216 = vector.load %arg14[%c0_94, %c0_95] : memref<32x32xf32, #tpu.memory_space<vmem>>, vector<32x32xf32>
    %cst_96 = arith.constant dense<0.000000e+00> : vector<8x32xf32>
    %217 = tpu.matmul %215, %216, %cst_96 {dimension_numbers = #tpu.dot_dimension_numbers<[1], [0], [0], [1], [0, 0, 1, 1], [], []>} : vector<8x32xf32>, vector<32x32xf32>, vector<8x32xf32> -> vector<8x32xf32>
    %c0_97 = arith.constant 0 : index
    %c0_98 = arith.constant 0 : index
    %218 = vector.load %arg15[%c0_97, %c0_98] : memref<1x32xf32, #tpu.memory_space<vmem>>, vector<1x32xf32>
    %219 = vector.broadcast %218 : vector<1x32xf32> to vector<8x32xf32>
    %220 = arith.addf %217, %219 : vector<8x32xf32>
    %cst_99 = arith.constant dense<0.000000e+00> : vector<8xf32>
    %221 = vector.multi_reduction <add>, %220, %cst_99 [1] : vector<8x32xf32> to vector<8xf32>
    %222 = vector.shape_cast %221 : vector<8xf32> to vector<8x1xf32>
    %223 = arith.mulf %220, %220 : vector<8x32xf32>
    %cst_100 = arith.constant dense<0.000000e+00> : vector<8xf32>
    %224 = vector.multi_reduction <add>, %223, %cst_100 [1] : vector<8x32xf32> to vector<8xf32>
    %225 = vector.shape_cast %224 : vector<8xf32> to vector<8x1xf32>
    %cst_101 = arith.constant 3.125000e-02 : f32
    %226 = vector.broadcast %cst_101 : f32 to vector<8x1xf32>
    %227 = arith.mulf %222, %226 : vector<8x1xf32>
    %cst_102 = arith.constant 3.125000e-02 : f32
    %228 = vector.broadcast %cst_102 : f32 to vector<8x1xf32>
    %229 = arith.mulf %225, %228 : vector<8x1xf32>
    %230 = arith.mulf %227, %227 : vector<8x1xf32>
    %231 = arith.subf %229, %230 : vector<8x1xf32>
    %cst_103 = arith.constant 0.000000e+00 : f32
    %232 = vector.broadcast %cst_103 : f32 to vector<8x1xf32>
    %233 = arith.maximumf %231, %232 : vector<8x1xf32>
    %234 = vector.broadcast %227 : vector<8x1xf32> to vector<8x32xf32>
    %235 = arith.subf %220, %234 : vector<8x32xf32>
    %cst_104 = arith.constant 9.99999974E-6 : f32
    %236 = vector.broadcast %cst_104 : f32 to vector<8x1xf32>
    %237 = arith.addf %233, %236 : vector<8x1xf32>
    %238 = math.rsqrt %237 : vector<8x1xf32>
    %239 = vector.broadcast %238 : vector<8x1xf32> to vector<8x32xf32>
    %240 = arith.mulf %235, %239 : vector<8x32xf32>
    %cst_105 = arith.constant 5.000000e-01 : f32
    %241 = vector.broadcast %cst_105 : f32 to vector<8x32xf32>
    %242 = arith.mulf %241, %240 : vector<8x32xf32>
    %cst_106 = arith.constant 0.707106769 : f32
    %243 = vector.broadcast %cst_106 : f32 to vector<8x32xf32>
    %244 = arith.mulf %240, %243 : vector<8x32xf32>
    %245 = math.erf %244 : vector<8x32xf32>
    %cst_107 = arith.constant 1.000000e+00 : f32
    %246 = vector.broadcast %cst_107 : f32 to vector<8x32xf32>
    %247 = arith.addf %246, %245 : vector<8x32xf32>
    %248 = arith.mulf %242, %247 : vector<8x32xf32>
    %c0_108 = arith.constant 0 : index
    %c0_109 = arith.constant 0 : index
    %249 = vector.load %arg16[%c0_108, %c0_109] : memref<4x8xf32, #tpu.memory_space<vmem>>, vector<4x8xf32>
    %cst_110 = arith.constant dense<0.000000e+00> : vector<4x32xf32>
    %250 = tpu.matmul %249, %248, %cst_110 {dimension_numbers = #tpu.dot_dimension_numbers<[1], [0], [0], [1], [0, 0, 1, 1], [], []>} : vector<4x8xf32>, vector<8x32xf32>, vector<4x32xf32> -> vector<4x32xf32>
    %c0_111 = arith.constant 0 : index
    %c0_112 = arith.constant 0 : index
    %251 = vector.load %arg17[%c0_111, %c0_112] : memref<4x1xf32, #tpu.memory_space<vmem>>, vector<4x1xf32>
    %252 = vector.broadcast %251 : vector<4x1xf32> to vector<4x32xf32>
    %253 = arith.addf %250, %252 : vector<4x32xf32>
    %cst_113 = arith.constant dense<0.000000e+00> : vector<32xf32>
    %254 = vector.multi_reduction <add>, %253, %cst_113 [0] : vector<4x32xf32> to vector<32xf32>
    %255 = vector.shape_cast %254 : vector<32xf32> to vector<1x32xf32>
    %256 = arith.mulf %253, %253 : vector<4x32xf32>
    %cst_114 = arith.constant dense<0.000000e+00> : vector<32xf32>
    %257 = vector.multi_reduction <add>, %256, %cst_114 [0] : vector<4x32xf32> to vector<32xf32>
    %258 = vector.shape_cast %257 : vector<32xf32> to vector<1x32xf32>
    %cst_115 = arith.constant 2.500000e-01 : f32
    %259 = vector.broadcast %cst_115 : f32 to vector<1x32xf32>
    %260 = arith.mulf %255, %259 : vector<1x32xf32>
    %cst_116 = arith.constant 2.500000e-01 : f32
    %261 = vector.broadcast %cst_116 : f32 to vector<1x32xf32>
    %262 = arith.mulf %258, %261 : vector<1x32xf32>
    %263 = arith.mulf %260, %260 : vector<1x32xf32>
    %264 = arith.subf %262, %263 : vector<1x32xf32>
    %cst_117 = arith.constant 0.000000e+00 : f32
    %265 = vector.broadcast %cst_117 : f32 to vector<1x32xf32>
    %266 = arith.maximumf %264, %265 : vector<1x32xf32>
    %267 = vector.broadcast %260 : vector<1x32xf32> to vector<4x32xf32>
    %268 = arith.subf %253, %267 : vector<4x32xf32>
    %cst_118 = arith.constant 9.99999974E-6 : f32
    %269 = vector.broadcast %cst_118 : f32 to vector<1x32xf32>
    %270 = arith.addf %266, %269 : vector<1x32xf32>
    %271 = math.rsqrt %270 : vector<1x32xf32>
    %272 = vector.broadcast %271 : vector<1x32xf32> to vector<4x32xf32>
    %273 = arith.mulf %268, %272 : vector<4x32xf32>
    %cst_119 = arith.constant 5.000000e-01 : f32
    %274 = vector.broadcast %cst_119 : f32 to vector<4x32xf32>
    %275 = arith.mulf %274, %273 : vector<4x32xf32>
    %cst_120 = arith.constant 0.707106769 : f32
    %276 = vector.broadcast %cst_120 : f32 to vector<4x32xf32>
    %277 = arith.mulf %273, %276 : vector<4x32xf32>
    %278 = math.erf %277 : vector<4x32xf32>
    %cst_121 = arith.constant 1.000000e+00 : f32
    %279 = vector.broadcast %cst_121 : f32 to vector<4x32xf32>
    %280 = arith.addf %279, %278 : vector<4x32xf32>
    %281 = arith.mulf %275, %280 : vector<4x32xf32>
    %c0_122 = arith.constant 0 : index
    %c0_123 = arith.constant 0 : index
    %282 = vector.load %arg18[%c0_122, %c0_123] : memref<32x32xf32, #tpu.memory_space<vmem>>, vector<32x32xf32>
    %cst_124 = arith.constant dense<0.000000e+00> : vector<4x32xf32>
    %283 = tpu.matmul %281, %282, %cst_124 {dimension_numbers = #tpu.dot_dimension_numbers<[1], [0], [0], [1], [0, 0, 1, 1], [], []>} : vector<4x32xf32>, vector<32x32xf32>, vector<4x32xf32> -> vector<4x32xf32>
    %c0_125 = arith.constant 0 : index
    %c0_126 = arith.constant 0 : index
    %284 = vector.load %arg19[%c0_125, %c0_126] : memref<1x32xf32, #tpu.memory_space<vmem>>, vector<1x32xf32>
    %285 = vector.broadcast %284 : vector<1x32xf32> to vector<4x32xf32>
    %286 = arith.addf %283, %285 : vector<4x32xf32>
    %cst_127 = arith.constant dense<0.000000e+00> : vector<4xf32>
    %287 = vector.multi_reduction <add>, %286, %cst_127 [1] : vector<4x32xf32> to vector<4xf32>
    %288 = vector.shape_cast %287 : vector<4xf32> to vector<4x1xf32>
    %289 = arith.mulf %286, %286 : vector<4x32xf32>
    %cst_128 = arith.constant dense<0.000000e+00> : vector<4xf32>
    %290 = vector.multi_reduction <add>, %289, %cst_128 [1] : vector<4x32xf32> to vector<4xf32>
    %291 = vector.shape_cast %290 : vector<4xf32> to vector<4x1xf32>
    %cst_129 = arith.constant 3.125000e-02 : f32
    %292 = vector.broadcast %cst_129 : f32 to vector<4x1xf32>
    %293 = arith.mulf %288, %292 : vector<4x1xf32>
    %cst_130 = arith.constant 3.125000e-02 : f32
    %294 = vector.broadcast %cst_130 : f32 to vector<4x1xf32>
    %295 = arith.mulf %291, %294 : vector<4x1xf32>
    %296 = arith.mulf %293, %293 : vector<4x1xf32>
    %297 = arith.subf %295, %296 : vector<4x1xf32>
    %cst_131 = arith.constant 0.000000e+00 : f32
    %298 = vector.broadcast %cst_131 : f32 to vector<4x1xf32>
    %299 = arith.maximumf %297, %298 : vector<4x1xf32>
    %300 = vector.broadcast %293 : vector<4x1xf32> to vector<4x32xf32>
    %301 = arith.subf %286, %300 : vector<4x32xf32>
    %cst_132 = arith.constant 9.99999974E-6 : f32
    %302 = vector.broadcast %cst_132 : f32 to vector<4x1xf32>
    %303 = arith.addf %299, %302 : vector<4x1xf32>
    %304 = math.rsqrt %303 : vector<4x1xf32>
    %305 = vector.broadcast %304 : vector<4x1xf32> to vector<4x32xf32>
    %306 = arith.mulf %301, %305 : vector<4x32xf32>
    %cst_133 = arith.constant 5.000000e-01 : f32
    %307 = vector.broadcast %cst_133 : f32 to vector<4x32xf32>
    %308 = arith.mulf %307, %306 : vector<4x32xf32>
    %cst_134 = arith.constant 0.707106769 : f32
    %309 = vector.broadcast %cst_134 : f32 to vector<4x32xf32>
    %310 = arith.mulf %306, %309 : vector<4x32xf32>
    %311 = math.erf %310 : vector<4x32xf32>
    %cst_135 = arith.constant 1.000000e+00 : f32
    %312 = vector.broadcast %cst_135 : f32 to vector<4x32xf32>
    %313 = arith.addf %312, %311 : vector<4x32xf32>
    %314 = arith.mulf %308, %313 : vector<4x32xf32>
    %c0_136 = arith.constant 0 : index
    %c0_137 = arith.constant 0 : index
    %315 = vector.load %arg20[%c0_136, %c0_137] : memref<2x4xf32, #tpu.memory_space<vmem>>, vector<2x4xf32>
    %cst_138 = arith.constant dense<0.000000e+00> : vector<2x32xf32>
    %316 = tpu.matmul %315, %314, %cst_138 {dimension_numbers = #tpu.dot_dimension_numbers<[1], [0], [0], [1], [0, 0, 1, 1], [], []>} : vector<2x4xf32>, vector<4x32xf32>, vector<2x32xf32> -> vector<2x32xf32>
    %c0_139 = arith.constant 0 : index
    %c0_140 = arith.constant 0 : index
    %317 = vector.load %arg21[%c0_139, %c0_140] : memref<2x1xf32, #tpu.memory_space<vmem>>, vector<2x1xf32>
    %318 = vector.broadcast %317 : vector<2x1xf32> to vector<2x32xf32>
    %319 = arith.addf %316, %318 : vector<2x32xf32>
    %cst_141 = arith.constant dense<0.000000e+00> : vector<32xf32>
    %320 = vector.multi_reduction <add>, %319, %cst_141 [0] : vector<2x32xf32> to vector<32xf32>
    %321 = vector.shape_cast %320 : vector<32xf32> to vector<1x32xf32>
    %322 = arith.mulf %319, %319 : vector<2x32xf32>
    %cst_142 = arith.constant dense<0.000000e+00> : vector<32xf32>
    %323 = vector.multi_reduction <add>, %322, %cst_142 [0] : vector<2x32xf32> to vector<32xf32>
    %324 = vector.shape_cast %323 : vector<32xf32> to vector<1x32xf32>
    %cst_143 = arith.constant 5.000000e-01 : f32
    %325 = vector.broadcast %cst_143 : f32 to vector<1x32xf32>
    %326 = arith.mulf %321, %325 : vector<1x32xf32>
    %cst_144 = arith.constant 5.000000e-01 : f32
    %327 = vector.broadcast %cst_144 : f32 to vector<1x32xf32>
    %328 = arith.mulf %324, %327 : vector<1x32xf32>
    %329 = arith.mulf %326, %326 : vector<1x32xf32>
    %330 = arith.subf %328, %329 : vector<1x32xf32>
    %cst_145 = arith.constant 0.000000e+00 : f32
    %331 = vector.broadcast %cst_145 : f32 to vector<1x32xf32>
    %332 = arith.maximumf %330, %331 : vector<1x32xf32>
    %333 = vector.broadcast %326 : vector<1x32xf32> to vector<2x32xf32>
    %334 = arith.subf %319, %333 : vector<2x32xf32>
    %cst_146 = arith.constant 9.99999974E-6 : f32
    %335 = vector.broadcast %cst_146 : f32 to vector<1x32xf32>
    %336 = arith.addf %332, %335 : vector<1x32xf32>
    %337 = math.rsqrt %336 : vector<1x32xf32>
    %338 = vector.broadcast %337 : vector<1x32xf32> to vector<2x32xf32>
    %339 = arith.mulf %334, %338 : vector<2x32xf32>
    %cst_147 = arith.constant 5.000000e-01 : f32
    %340 = vector.broadcast %cst_147 : f32 to vector<2x32xf32>
    %341 = arith.mulf %340, %339 : vector<2x32xf32>
    %cst_148 = arith.constant 0.707106769 : f32
    %342 = vector.broadcast %cst_148 : f32 to vector<2x32xf32>
    %343 = arith.mulf %339, %342 : vector<2x32xf32>
    %344 = math.erf %343 : vector<2x32xf32>
    %cst_149 = arith.constant 1.000000e+00 : f32
    %345 = vector.broadcast %cst_149 : f32 to vector<2x32xf32>
    %346 = arith.addf %345, %344 : vector<2x32xf32>
    %347 = arith.mulf %341, %346 : vector<2x32xf32>
    %c0_150 = arith.constant 0 : index
    %c0_151 = arith.constant 0 : index
    %348 = vector.load %arg23[%c0_150, %c0_151] : memref<1x5xf32, #tpu.memory_space<vmem>>, vector<1x5xf32>
    %349 = vector.extract_strided_slice %347 {offsets = [0, 0], sizes = [1, 32], strides = [1, 1]} : vector<2x32xf32> to vector<1x32xf32>
    %c0_152 = arith.constant 0 : index
    %c0_153 = arith.constant 0 : index
    %c0_154 = arith.constant 0 : index
    %350 = vector.load %arg22[%c0_152, %c0_153, %c0_154] : memref<2x32x5xf32, #tpu.memory_space<vmem>>, vector<1x32x5xf32>
    %351 = vector.shape_cast %350 : vector<1x32x5xf32> to vector<32x5xf32>
    %cst_155 = arith.constant dense<0.000000e+00> : vector<1x5xf32>
    %352 = tpu.matmul %349, %351, %cst_155 {dimension_numbers = #tpu.dot_dimension_numbers<[1], [0], [0], [1], [0, 0, 1, 1], [], []>} : vector<1x32xf32>, vector<32x5xf32>, vector<1x5xf32> -> vector<1x5xf32>
    %353 = arith.addf %348, %352 : vector<1x5xf32>
    %354 = vector.extract_strided_slice %347 {offsets = [1, 0], sizes = [1, 32], strides = [1, 1]} : vector<2x32xf32> to vector<1x32xf32>
    %c1 = arith.constant 1 : index
    %c0_156 = arith.constant 0 : index
    %c0_157 = arith.constant 0 : index
    %355 = vector.load %arg22[%c1, %c0_156, %c0_157] : memref<2x32x5xf32, #tpu.memory_space<vmem>>, vector<1x32x5xf32>
    %356 = vector.shape_cast %355 : vector<1x32x5xf32> to vector<32x5xf32>
    %cst_158 = arith.constant dense<0.000000e+00> : vector<1x5xf32>
    %357 = tpu.matmul %354, %356, %cst_158 {dimension_numbers = #tpu.dot_dimension_numbers<[1], [0], [0], [1], [0, 0, 1, 1], [], []>} : vector<1x32xf32>, vector<32x5xf32>, vector<1x5xf32> -> vector<1x5xf32>
    %358 = arith.addf %353, %357 : vector<1x5xf32>
    %c0_159 = arith.constant 0 : index
    %c0_160 = arith.constant 0 : index
    %c0_161 = arith.constant 0 : index
    %359 = vector.load %arg3[%c0_159, %c0_160, %c0_161] : memref<1x1x5xf32, #tpu.memory_space<vmem>>, vector<1x1x5xf32>
    %360 = vector.shape_cast %359 : vector<1x1x5xf32> to vector<1x5xf32>
    %361 = arith.addf %358, %360 : vector<1x5xf32>
    %cst_162 = arith.constant dense<0xFF800000> : vector<1xf32>
    %362 = vector.multi_reduction <maximumf>, %361, %cst_162 [1] : vector<1x5xf32> to vector<1xf32>
    %363 = vector.shape_cast %362 : vector<1xf32> to vector<1x1xf32>
    %364 = tpu.iota {dimensions = array<i32: 1>} : vector<1x5xi32>
    %365 = vector.broadcast %363 : vector<1x1xf32> to vector<1x5xf32>
    %366 = arith.cmpf oge, %361, %365 : vector<1x5xf32>
    %c5_i32 = arith.constant 5 : i32
    %367 = vector.broadcast %c5_i32 : i32 to vector<1x5xi32>
    %368 = arith.select %366, %364, %367 : vector<1x5xi1>, vector<1x5xi32>
    %cst_163 = arith.constant dense<2147483647> : vector<1xi32>
    %369 = vector.multi_reduction <minsi>, %368, %cst_163 [1] : vector<1x5xi32> to vector<1xi32>
    %370 = vector.shape_cast %369 : vector<1xi32> to vector<1x1xi32>
    %371 = vector.broadcast %370 : vector<1x1xi32> to vector<1x5xi32>
    %372 = arith.cmpi eq, %364, %371 : vector<1x5xi32>
    %373 = arith.extui %372 : vector<1x5xi1> to vector<1x5xi32>
    %374 = arith.sitofp %373 : vector<1x5xi32> to vector<1x5xf32>
    %cst_164 = arith.constant 0.000000e+00 : f32
    %375 = vector.broadcast %cst_164 : f32 to vector<1x60xf32>
    %376 = vector.extract_strided_slice %149 {offsets = [0, 0], sizes = [1, 32], strides = [1, 1]} : vector<8x32xf32> to vector<1x32xf32>
    %c0_165 = arith.constant 0 : index
    %c0_166 = arith.constant 0 : index
    %c0_167 = arith.constant 0 : index
    %377 = vector.load %arg24[%c0_165, %c0_166, %c0_167] : memref<8x32x60xf32, #tpu.memory_space<vmem>>, vector<1x32x60xf32>
    %378 = vector.shape_cast %377 : vector<1x32x60xf32> to vector<32x60xf32>
    %cst_168 = arith.constant dense<0.000000e+00> : vector<1x60xf32>
    %379 = tpu.matmul %376, %378, %cst_168 {dimension_numbers = #tpu.dot_dimension_numbers<[1], [0], [0], [1], [0, 0, 1, 1], [], []>} : vector<1x32xf32>, vector<32x60xf32>, vector<1x60xf32> -> vector<1x60xf32>
    %380 = arith.addf %375, %379 : vector<1x60xf32>
    %381 = vector.extract_strided_slice %149 {offsets = [1, 0], sizes = [1, 32], strides = [1, 1]} : vector<8x32xf32> to vector<1x32xf32>
    %c1_169 = arith.constant 1 : index
    %c0_170 = arith.constant 0 : index
    %c0_171 = arith.constant 0 : index
    %382 = vector.load %arg24[%c1_169, %c0_170, %c0_171] : memref<8x32x60xf32, #tpu.memory_space<vmem>>, vector<1x32x60xf32>
    %383 = vector.shape_cast %382 : vector<1x32x60xf32> to vector<32x60xf32>
    %cst_172 = arith.constant dense<0.000000e+00> : vector<1x60xf32>
    %384 = tpu.matmul %381, %383, %cst_172 {dimension_numbers = #tpu.dot_dimension_numbers<[1], [0], [0], [1], [0, 0, 1, 1], [], []>} : vector<1x32xf32>, vector<32x60xf32>, vector<1x60xf32> -> vector<1x60xf32>
    %385 = arith.addf %380, %384 : vector<1x60xf32>
    %386 = vector.extract_strided_slice %149 {offsets = [2, 0], sizes = [1, 32], strides = [1, 1]} : vector<8x32xf32> to vector<1x32xf32>
    %c2 = arith.constant 2 : index
    %c0_173 = arith.constant 0 : index
    %c0_174 = arith.constant 0 : index
    %387 = vector.load %arg24[%c2, %c0_173, %c0_174] : memref<8x32x60xf32, #tpu.memory_space<vmem>>, vector<1x32x60xf32>
    %388 = vector.shape_cast %387 : vector<1x32x60xf32> to vector<32x60xf32>
    %cst_175 = arith.constant dense<0.000000e+00> : vector<1x60xf32>
    %389 = tpu.matmul %386, %388, %cst_175 {dimension_numbers = #tpu.dot_dimension_numbers<[1], [0], [0], [1], [0, 0, 1, 1], [], []>} : vector<1x32xf32>, vector<32x60xf32>, vector<1x60xf32> -> vector<1x60xf32>
    %390 = arith.addf %385, %389 : vector<1x60xf32>
    %391 = vector.extract_strided_slice %149 {offsets = [3, 0], sizes = [1, 32], strides = [1, 1]} : vector<8x32xf32> to vector<1x32xf32>
    %c3 = arith.constant 3 : index
    %c0_176 = arith.constant 0 : index
    %c0_177 = arith.constant 0 : index
    %392 = vector.load %arg24[%c3, %c0_176, %c0_177] : memref<8x32x60xf32, #tpu.memory_space<vmem>>, vector<1x32x60xf32>
    %393 = vector.shape_cast %392 : vector<1x32x60xf32> to vector<32x60xf32>
    %cst_178 = arith.constant dense<0.000000e+00> : vector<1x60xf32>
    %394 = tpu.matmul %391, %393, %cst_178 {dimension_numbers = #tpu.dot_dimension_numbers<[1], [0], [0], [1], [0, 0, 1, 1], [], []>} : vector<1x32xf32>, vector<32x60xf32>, vector<1x60xf32> -> vector<1x60xf32>
    %395 = arith.addf %390, %394 : vector<1x60xf32>
    %396 = vector.extract_strided_slice %149 {offsets = [4, 0], sizes = [1, 32], strides = [1, 1]} : vector<8x32xf32> to vector<1x32xf32>
    %c4 = arith.constant 4 : index
    %c0_179 = arith.constant 0 : index
    %c0_180 = arith.constant 0 : index
    %397 = vector.load %arg24[%c4, %c0_179, %c0_180] : memref<8x32x60xf32, #tpu.memory_space<vmem>>, vector<1x32x60xf32>
    %398 = vector.shape_cast %397 : vector<1x32x60xf32> to vector<32x60xf32>
    %cst_181 = arith.constant dense<0.000000e+00> : vector<1x60xf32>
    %399 = tpu.matmul %396, %398, %cst_181 {dimension_numbers = #tpu.dot_dimension_numbers<[1], [0], [0], [1], [0, 0, 1, 1], [], []>} : vector<1x32xf32>, vector<32x60xf32>, vector<1x60xf32> -> vector<1x60xf32>
    %400 = arith.addf %395, %399 : vector<1x60xf32>
    %401 = vector.extract_strided_slice %149 {offsets = [5, 0], sizes = [1, 32], strides = [1, 1]} : vector<8x32xf32> to vector<1x32xf32>
    %c5 = arith.constant 5 : index
    %c0_182 = arith.constant 0 : index
    %c0_183 = arith.constant 0 : index
    %402 = vector.load %arg24[%c5, %c0_182, %c0_183] : memref<8x32x60xf32, #tpu.memory_space<vmem>>, vector<1x32x60xf32>
    %403 = vector.shape_cast %402 : vector<1x32x60xf32> to vector<32x60xf32>
    %cst_184 = arith.constant dense<0.000000e+00> : vector<1x60xf32>
    %404 = tpu.matmul %401, %403, %cst_184 {dimension_numbers = #tpu.dot_dimension_numbers<[1], [0], [0], [1], [0, 0, 1, 1], [], []>} : vector<1x32xf32>, vector<32x60xf32>, vector<1x60xf32> -> vector<1x60xf32>
    %405 = arith.addf %400, %404 : vector<1x60xf32>
    %406 = vector.extract_strided_slice %149 {offsets = [6, 0], sizes = [1, 32], strides = [1, 1]} : vector<8x32xf32> to vector<1x32xf32>
    %c6 = arith.constant 6 : index
    %c0_185 = arith.constant 0 : index
    %c0_186 = arith.constant 0 : index
    %407 = vector.load %arg24[%c6, %c0_185, %c0_186] : memref<8x32x60xf32, #tpu.memory_space<vmem>>, vector<1x32x60xf32>
    %408 = vector.shape_cast %407 : vector<1x32x60xf32> to vector<32x60xf32>
    %cst_187 = arith.constant dense<0.000000e+00> : vector<1x60xf32>
    %409 = tpu.matmul %406, %408, %cst_187 {dimension_numbers = #tpu.dot_dimension_numbers<[1], [0], [0], [1], [0, 0, 1, 1], [], []>} : vector<1x32xf32>, vector<32x60xf32>, vector<1x60xf32> -> vector<1x60xf32>
    %410 = arith.addf %405, %409 : vector<1x60xf32>
    %411 = vector.extract_strided_slice %149 {offsets = [7, 0], sizes = [1, 32], strides = [1, 1]} : vector<8x32xf32> to vector<1x32xf32>
    %c7 = arith.constant 7 : index
    %c0_188 = arith.constant 0 : index
    %c0_189 = arith.constant 0 : index
    %412 = vector.load %arg24[%c7, %c0_188, %c0_189] : memref<8x32x60xf32, #tpu.memory_space<vmem>>, vector<1x32x60xf32>
    %413 = vector.shape_cast %412 : vector<1x32x60xf32> to vector<32x60xf32>
    %cst_190 = arith.constant dense<0.000000e+00> : vector<1x60xf32>
    %414 = tpu.matmul %411, %413, %cst_190 {dimension_numbers = #tpu.dot_dimension_numbers<[1], [0], [0], [1], [0, 0, 1, 1], [], []>} : vector<1x32xf32>, vector<32x60xf32>, vector<1x60xf32> -> vector<1x60xf32>
    %415 = arith.addf %410, %414 : vector<1x60xf32>
    %cst_191 = arith.constant 0.000000e+00 : f32
    %416 = vector.broadcast %cst_191 : f32 to vector<1x12xf32>
    %417 = vector.extract_strided_slice %374 {offsets = [0, 0], sizes = [1, 1], strides = [1, 1]} : vector<1x5xf32> to vector<1x1xf32>
    %418 = vector.extract_strided_slice %415 {offsets = [0, 0], sizes = [1, 12], strides = [1, 1]} : vector<1x60xf32> to vector<1x12xf32>
    %419 = vector.broadcast %417 : vector<1x1xf32> to vector<1x12xf32>
    %420 = arith.mulf %419, %418 : vector<1x12xf32>
    %421 = arith.addf %416, %420 : vector<1x12xf32>
    %422 = vector.extract_strided_slice %374 {offsets = [0, 1], sizes = [1, 1], strides = [1, 1]} : vector<1x5xf32> to vector<1x1xf32>
    %423 = vector.extract_strided_slice %415 {offsets = [0, 12], sizes = [1, 12], strides = [1, 1]} : vector<1x60xf32> to vector<1x12xf32>
    %424 = vector.broadcast %422 : vector<1x1xf32> to vector<1x12xf32>
    %425 = arith.mulf %424, %423 : vector<1x12xf32>
    %426 = arith.addf %421, %425 : vector<1x12xf32>
    %427 = vector.extract_strided_slice %374 {offsets = [0, 2], sizes = [1, 1], strides = [1, 1]} : vector<1x5xf32> to vector<1x1xf32>
    %428 = vector.extract_strided_slice %415 {offsets = [0, 24], sizes = [1, 12], strides = [1, 1]} : vector<1x60xf32> to vector<1x12xf32>
    %429 = vector.broadcast %427 : vector<1x1xf32> to vector<1x12xf32>
    %430 = arith.mulf %429, %428 : vector<1x12xf32>
    %431 = arith.addf %426, %430 : vector<1x12xf32>
    %432 = vector.extract_strided_slice %374 {offsets = [0, 3], sizes = [1, 1], strides = [1, 1]} : vector<1x5xf32> to vector<1x1xf32>
    %433 = vector.extract_strided_slice %415 {offsets = [0, 36], sizes = [1, 12], strides = [1, 1]} : vector<1x60xf32> to vector<1x12xf32>
    %434 = vector.broadcast %432 : vector<1x1xf32> to vector<1x12xf32>
    %435 = arith.mulf %434, %433 : vector<1x12xf32>
    %436 = arith.addf %431, %435 : vector<1x12xf32>
    %437 = vector.extract_strided_slice %374 {offsets = [0, 4], sizes = [1, 1], strides = [1, 1]} : vector<1x5xf32> to vector<1x1xf32>
    %438 = vector.extract_strided_slice %415 {offsets = [0, 48], sizes = [1, 12], strides = [1, 1]} : vector<1x60xf32> to vector<1x12xf32>
    %439 = vector.broadcast %437 : vector<1x1xf32> to vector<1x12xf32>
    %440 = arith.mulf %439, %438 : vector<1x12xf32>
    %441 = arith.addf %436, %440 : vector<1x12xf32>
    %cst_192 = arith.constant dense<0xFF800000> : vector<1xf32>
    %442 = vector.multi_reduction <maximumf>, %441, %cst_192 [1] : vector<1x12xf32> to vector<1xf32>
    %443 = vector.shape_cast %442 : vector<1xf32> to vector<1x1xf32>
    %444 = vector.broadcast %443 : vector<1x1xf32> to vector<1x12xf32>
    %445 = arith.subf %441, %444 : vector<1x12xf32>
    %446 = math.exp %445 : vector<1x12xf32>
    %cst_193 = arith.constant dense<0.000000e+00> : vector<1xf32>
    %447 = vector.multi_reduction <add>, %446, %cst_193 [1] : vector<1x12xf32> to vector<1xf32>
    %448 = vector.shape_cast %447 : vector<1xf32> to vector<1x1xf32>
    %449 = vector.broadcast %448 : vector<1x1xf32> to vector<1x12xf32>
    %450 = arith.divf %446, %449 : vector<1x12xf32>
    %c0_194 = arith.constant 0 : index
    %c0_195 = arith.constant 0 : index
    %c0_196 = arith.constant 0 : index
    %451 = vector.load %arg25[%c0_194, %c0_195, %c0_196] : memref<1x1x12xf32, #tpu.memory_space<vmem>>, vector<1x1x12xf32>
    %452 = vector.shape_cast %451 : vector<1x1x12xf32> to vector<1x12xf32>
    %453 = vector.shape_cast %450 : vector<1x12xf32> to vector<1x1x12xf32>
    tpu.vector_store %arg25[%c0_194, %c0_195, %c0_196], %453 {strides = array<i32>} : memref<1x1x12xf32, #tpu.memory_space<vmem>>, vector<1x1x12xf32>,
    return
  }
  func.func @transform_0(%arg0: i32) -> (i32, i32, i32) {
    %c0_i32 = arith.constant 0 : i32
    %c0_i32_0 = arith.constant 0 : i32
    %c0_i32_1 = arith.constant 0 : i32
    return %arg0, %c0_i32, %c0_i32_0 : i32, i32, i32
  }
  func.func @transform_1(%arg0: i32) -> (i32, i32, i32) {
    %c0_i32 = arith.constant 0 : i32
    %c0_i32_0 = arith.constant 0 : i32
    %c0_i32_1 = arith.constant 0 : i32
    return %arg0, %c0_i32, %c0_i32_0 : i32, i32, i32
  }
  func.func @transform_2(%arg0: i32) -> (i32, i32, i32) {
    %c0_i32 = arith.constant 0 : i32
    %c0_i32_0 = arith.constant 0 : i32
    %c0_i32_1 = arith.constant 0 : i32
    return %arg0, %c0_i32, %c0_i32_0 : i32, i32, i32
  }
  func.func @transform_3(%arg0: i32) -> (i32, i32) {
    %c0_i32 = arith.constant 0 : i32
    %c0_i32_0 = arith.constant 0 : i32
    %c0_i32_1 = arith.constant 0 : i32
    return %c0_i32, %c0_i32_0 : i32, i32
  }
  func.func @transform_4(%arg0: i32) -> (i32, i32) {
    %c0_i32 = arith.constant 0 : i32
    %c0_i32_0 = arith.constant 0 : i32
    %c0_i32_1 = arith.constant 0 : i32
    return %c0_i32, %c0_i32_0 : i32, i32
  }
  func.func @transform_5(%arg0: i32) -> (i32, i32) {
    %c0_i32 = arith.constant 0 : i32
    %c0_i32_0 = arith.constant 0 : i32
    %c0_i32_1 = arith.constant 0 : i32
    return %c0_i32, %c0_i32_0 : i32, i32
  }
  func.func @transform_6(%arg0: i32) -> (i32, i32) {
    %c0_i32 = arith.constant 0 : i32
    %c0_i32_0 = arith.constant 0 : i32
    %c0_i32_1 = arith.constant 0 : i32
    return %c0_i32, %c0_i32_0 : i32, i32
  }
  func.func @transform_7(%arg0: i32) -> (i32, i32) {
    %c0_i32 = arith.constant 0 : i32
    %c0_i32_0 = arith.constant 0 : i32
    %c0_i32_1 = arith.constant 0 : i32
    return %c0_i32, %c0_i32_0 : i32, i32
  }
  func.func @transform_8(%arg0: i32) -> (i32, i32) {
    %c0_i32 = arith.constant 0 : i32
    %c0_i32_0 = arith.constant 0 : i32
    %c0_i32_1 = arith.constant 0 : i32
    return %c0_i32, %c0_i32_0 : i32, i32
  }
  func.func @transform_9(%arg0: i32) -> (i32, i32) {
    %c0_i32 = arith.constant 0 : i32
    %c0_i32_0 = arith.constant 0 : i32
    %c0_i32_1 = arith.constant 0 : i32
    return %c0_i32, %c0_i32_0 : i32, i32
  }
  func.func @transform_10(%arg0: i32) -> (i32, i32) {
    %c0_i32 = arith.constant 0 : i32
    %c0_i32_0 = arith.constant 0 : i32
    %c0_i32_1 = arith.constant 0 : i32
    return %c0_i32, %c0_i32_0 : i32, i32
  }
  func.func @transform_11(%arg0: i32) -> (i32, i32) {
    %c0_i32 = arith.constant 0 : i32
    %c0_i32_0 = arith.constant 0 : i32
    %c0_i32_1 = arith.constant 0 : i32
    return %c0_i32, %c0_i32_0 : i32, i32
  }
  func.func @transform_12(%arg0: i32) -> (i32, i32) {
    %c0_i32 = arith.constant 0 : i32
    %c0_i32_0 = arith.constant 0 : i32
    %c0_i32_1 = arith.constant 0 : i32
    return %c0_i32, %c0_i32_0 : i32, i32
  }
  func.func @transform_13(%arg0: i32) -> (i32, i32) {
    %c0_i32 = arith.constant 0 : i32
    %c0_i32_0 = arith.constant 0 : i32
    %c0_i32_1 = arith.constant 0 : i32
    return %c0_i32, %c0_i32_0 : i32, i32
  }
  func.func @transform_14(%arg0: i32) -> (i32, i32) {
    %c0_i32 = arith.constant 0 : i32
    %c0_i32_0 = arith.constant 0 : i32
    %c0_i32_1 = arith.constant 0 : i32
    return %c0_i32, %c0_i32_0 : i32, i32
  }
  func.func @transform_15(%arg0: i32) -> (i32, i32) {
    %c0_i32 = arith.constant 0 : i32
    %c0_i32_0 = arith.constant 0 : i32
    %c0_i32_1 = arith.constant 0 : i32
    return %c0_i32, %c0_i32_0 : i32, i32
  }
  func.func @transform_16(%arg0: i32) -> (i32, i32) {
    %c0_i32 = arith.constant 0 : i32
    %c0_i32_0 = arith.constant 0 : i32
    %c0_i32_1 = arith.constant 0 : i32
    return %c0_i32, %c0_i32_0 : i32, i32
  }
  func.func @transform_17(%arg0: i32) -> (i32, i32) {
    %c0_i32 = arith.constant 0 : i32
    %c0_i32_0 = arith.constant 0 : i32
    %c0_i32_1 = arith.constant 0 : i32
    return %c0_i32, %c0_i32_0 : i32, i32
  }
  func.func @transform_18(%arg0: i32) -> (i32, i32) {
    %c0_i32 = arith.constant 0 : i32
    %c0_i32_0 = arith.constant 0 : i32
    %c0_i32_1 = arith.constant 0 : i32
    return %c0_i32, %c0_i32_0 : i32, i32
  }
  func.func @transform_19(%arg0: i32) -> (i32, i32) {
    %c0_i32 = arith.constant 0 : i32
    %c0_i32_0 = arith.constant 0 : i32
    %c0_i32_1 = arith.constant 0 : i32
    return %c0_i32, %c0_i32_0 : i32, i32
  }
  func.func @transform_20(%arg0: i32) -> (i32, i32) {
    %c0_i32 = arith.constant 0 : i32
    %c0_i32_0 = arith.constant 0 : i32
    %c0_i32_1 = arith.constant 0 : i32
    return %c0_i32, %c0_i32_0 : i32, i32
  }
  func.func @transform_21(%arg0: i32) -> (i32, i32, i32) {
    %c0_i32 = arith.constant 0 : i32
    %c0_i32_0 = arith.constant 0 : i32
    %c0_i32_1 = arith.constant 0 : i32
    %c0_i32_2 = arith.constant 0 : i32
    return %c0_i32, %c0_i32_0, %c0_i32_1 : i32, i32, i32
  }
  func.func @transform_22(%arg0: i32) -> (i32, i32) {
    %c0_i32 = arith.constant 0 : i32
    %c0_i32_0 = arith.constant 0 : i32
    %c0_i32_1 = arith.constant 0 : i32
    return %c0_i32, %c0_i32_0 : i32, i32
  }
  func.func @transform_23(%arg0: i32) -> (i32, i32, i32) {
    %c0_i32 = arith.constant 0 : i32
    %c0_i32_0 = arith.constant 0 : i32
    %c0_i32_1 = arith.constant 0 : i32
    %c0_i32_2 = arith.constant 0 : i32
    return %c0_i32, %c0_i32_0, %c0_i32_1 : i32, i32, i32
  }
  func.func @transform_24(%arg0: i32) -> (i32, i32, i32) {
    %c0_i32 = arith.constant 0 : i32
    %c0_i32_0 = arith.constant 0 : i32
    %c0_i32_1 = arith.constant 0 : i32
    return %arg0, %c0_i32, %c0_i32_0 : i32, i32, i32
  }
}

</mosaic_0001>

<bundles_post_ra>
// kernel: basic_forward.1
= control target key start
LH: loop header
LB: loop body
LE: loop exit
PB: predicated region body
PF: predicated region fallthrough
CT: control target
= control target key end

     0   :  { %s4067_s0 = inlined_call_operand.vmem [shape: f32[2,16,4], index: 0, kind: input, shape index: {}]   ;;  %s4068_s1 = inlined_call_operand.vmem [shape: f32[2,8,4], index: 1, kind: input, shape index: {}]   ;;  %s4069_s2 = inlined_call_operand.vmem [shape: f32[2,1,5], index: 2, kind: input, shape index: {}]   ;;  %s4070_s3 = inlined_call_operand.vmem [shape: f32[16,16], index: 3, kind: input, shape index: {}]   ;;  %s4071_s4 = inlined_call_operand.vmem [shape: f32[8,8], index: 4, kind: input, shape index: {}]   ;;  %s4072_s5 = inlined_call_operand.vmem [shape: f32[4,32], index: 5, kind: input, shape index: {}]   ;;  %s4073_s6 = inlined_call_operand.vmem [shape: f32[1,32], index: 6, kind: input, shape index: {}]   ;;  %s4074_s7 = inlined_call_operand.vmem [shape: f32[4,32], index: 7, kind: input, shape index: {}]   ;;  %s4075_s8 = inlined_call_operand.vmem [shape: f32[1,32], index: 8, kind: input, shape index: {}]   ;;  %s4076_s9 = inlined_call_operand.vmem [shape: f32[32,32], index: 9, kind: input, shape index: {}]   ;;  %s4077_s10 = inlined_call_operand.vmem [shape: f32[1,32], index: 10, kind: input, shape index: {}]   ;;  %s4078_s11 = inlined_call_operand.vmem [shape: f32[8,16], index: 11, kind: input, shape index: {}]   ;;  %s4079_s12 = inlined_call_operand.vmem [shape: f32[8,1], index: 12, kind: input, shape index: {}]   ;;  %s4080_s13 = inlined_call_operand.vmem [shape: f32[32,32], index: 13, kind: input, shape index: {}]   ;;  %s4081_s14 = inlined_call_operand.vmem [shape: f32[1,32], index: 14, kind: input, shape index: {}]   ;;  %s4082_s15 = inlined_call_operand.vmem [shape: f32[4,8], index: 15, kind: input, shape index: {}]   ;;  %s4083_s16 = inlined_call_operand.vmem [shape: f32[4,1], index: 16, kind: input, shape index: {}]   ;;  %s4084_s17 = inlined_call_operand.vmem [shape: f32[32,32], index: 17, kind: input, shape index: {}]   ;;  %s4085_s18 = inlined_call_operand.vmem [shape: f32[1,32], index: 18, kind: input, shape index: {}]   ;;  %s4086_s19 = inlined_call_operand.vmem [shape: f32[2,4], index: 19, kind: input, shape index: {}]   ;;  %s4087_s20 = inlined_call_operand.vmem [shape: f32[2,1], index: 20, kind: input, shape index: {}]   ;;  %s4088_s21 = inlined_call_operand.vmem [shape: f32[2,32,5], index: 21, kind: input, shape index: {}]   ;;  %s4089_s22 = inlined_call_operand.vmem [shape: f32[1,5], index: 22, kind: input, shape index: {}]   ;;  %s4090_s23 = inlined_call_operand.vmem [shape: f32[8,32,60], index: 23, kind: input, shape index: {}]   ;;  %s4091_s24 = inlined_call_operand.vmem [shape: f32[2,1,12], index: 24, kind: output, shape index: {}]  }
   0x1   :  { %4093 = sst [smem:[#allocation2_spill]] %s4067_s0 }
   0x2   :  { %4094 = sst [smem:[#allocation3_spill]] %s4068_s1 }
   0x3   :  { %4095 = sst [smem:[#allocation4_spill]] %s4069_s2 }
   0x4   :  { %4096 = sst [smem:[#allocation5_spill]] %s4070_s3 }
   0x5   :  { %4097 = sst [smem:[#allocation6_spill]] %s4071_s4 }
   0x6   :  { %4098 = sst [smem:[#allocation7_spill]] %s4072_s5  ;;  %s3610_s5 = smov 0  }
   0x7   :  { %4099 = sst [smem:[#allocation8_spill]] %s4073_s6 }
   0x8   :  { %4100 = sst [smem:[#allocation9_spill]] %s4074_s7 }
   0x9   :  { %4101 = sst [smem:[#allocation10_spill]] %s4075_s8 }
   0xa LB: > { %s3022_s26 = sadd.s32 4294967295, %s3472_s5   ;;  %p3026_p0 = scmp.ge.s32.totalorder %s3472_s5, 1  ;;  %s3472_s5 = sphi %s3610_s5, %s34_s5  }
   0xb   : > { %p679_p1 = scmp.lt.s32.totalorder %s3472_s5, 3 }
   0xd   : > { %p680_p2 = pnand %p3026_p0, %p679_p1 }
   0xe   : > { %p750_p3 = scmp.lt.s32.totalorder (!%p680_p2), %s3022_s26, 1  ;;  %s4102_s6 = sld [smem:[#allocation5_spill]] (!%p680_p2) }
   0xf   : > { %683 = sbr.rel (%p680_p2) target bundleno = 3732 (0xe94), region = 116  ;;  %s4103_s7 = sld [smem:[#allocation2_spill]] (!%p680_p2) }
  0x10   : > { %s4104_s1 = sld [smem:[#allocation7_spill]] (!%p680_p2) }
  0x11   : > { %s4107_s4 = sld [smem:[#allocation6_spill]] (!%p680_p2) }
  0x12   : > { %s4108_s28 = sld [smem:[#allocation8_spill]] (!%p680_p2) }
  0x13   : > { %s4109_s0 = sld [smem:[#allocation10_spill]] (!%p680_p2) }
  0x14   : > { %v767_v0 = vlaneseq  ;;  %v773_v1 = vld [vmem:[%s4102_s6] sm:$0xff]  ;;  %vm775_vm0 = vcmask 130048   ;;  %s4112_s26 = smov (!%p750_p3, %s3022_s26), 1  ;;  %v774_v9 = vld [vmem:[%s4102_s6 + $0x8] sm:$0xff]  ;;  %vm874_vm1 = vcmask 1043456   ;;  %v3474_v12 = vmov 0.0  }
  0x15   : > { %3195 = vmatprep.mubr.msk.f32.mxu0 %vm775_vm0, %v773_v1  ;;  %s3101_s2 = sshll.u32 %s4112_s26, 4  ;;  %s3029_s29 = sshll.u32 %s4112_s26, 3  ;;  %vm3475_vm2 = vmmov 0   ;;  %vm1139_vm3 = vcmask 64512   ;;  %vm867_vm4 = vcmask 31744   ;;  %vm1045_vm5 = vcmask 261120  }
  0x16   : > { %v768_v2 = vshrl.u32 %v767_v0, 7  ;;  %s754_s30 = scalar_lea.vmem %s4103_s7, %s3101_s2  ;;  %v859_v10 = vld [vmem:[%s4104_s1] sm:$0xf]  ;;  %s4105_s2 = sld [smem:[#allocation9_spill]]  ;;  %v1406_v46 = vld [vmem:[%s4076_s9 + $0x18] sm:$0xff]  ;;  %v1405_v47 = vld [vmem:[%s4076_s9 + $0x10] sm:$0xff] }
  0x17   : > { %v765_v4 = vld [vmem:[%s754_s30] sm:$0xff]  ;;  %v766_v5 = vld [vmem:[%s754_s30 + $0x8] sm:$0xff]  ;;  %3198 = vmatprep.subr.msk.mxu1 %vm874_vm1, %v859_v10  ;;  %s4106_s30 = sld [smem:[#allocation3_spill]]  ;;  %vm1831_vm6 = vcmask 257024   ;;  %vm2049_vm7 = vcmask 254976   ;;  %vm2239_vm8 = vcmask 32768  }
  0x18   : > { %v769_v3 = vsub.s32 0, %v768_v2  ;;  %3199 = vmatpush3.msk.msra.mxu1 %vm874_vm1, %v859_v10  ;;  %v1138_v16 = vld [vmem:[%s4107_s4] sm:$0xff]  ;;  %v1404_v48 = vld [vmem:[%s4076_s9 + $0x8] sm:$0xff]  ;;  %s4110_s1 = sld [smem:[#allocation4_spill]]  ;;  %vm2941_vm12 = vcmask 90112  }
  0x19   : > { %v3670_v21 = vld [vmem:[%s4108_s28] ss:$0 sm:$0xff]  ;;  %s3481_s28 = smov 104  }
  0x1a   : > { %v770_v6 = vrot.slane %v765_v4, %v769_v3  ;;  %v3678_v25 = vld [vmem:[%s4109_s0] ss:$0 sm:$0xff]  ;;  %s3484_s0 = smov 80  }
  0x1b   : > { %v1403_v49 = vld [vmem:[%s4076_s9] sm:$0xff] }
  0x1c   : > { %v772_v7 = vsub.f32 %v766_v5, %v770_v6  ;;  %v771_v8 = vsub.f32 %v765_v4, %v770_v6  ;;  %v953_v11 = vld [vmem:[%s4105_s2] sm:$0xf]  ;;  %s3482_s2 = smov 116  }
  0x1d   : > { %3203 = vmatprep.subr.msk.mxu1 %vm874_vm1, %v953_v11  ;;  %s758_s3 = scalar_lea.vmem %s4106_s30, %s3029_s29  ;;  %s3483_s29 = smov 92  }
  0x1e   : > { %3191 = vmatprep.subr.mxu0 %v772_v7  ;;  %v1132_v13 = vld [vmem:[%s758_s3] sm:$0xff]  ;;  %s761_s27 = scalar_lea.vmem %s4110_s1, %s4112_s26  ;;  %s764_s3 = scalar_lea.vmem %s4091_s24, %s4112_s26 }
  0x1f   : > { %3192 = vmatpush3.msra.mxu0 %v772_v7  ;;  %v1136_v14 = vrot.slane %v1132_v13, %v769_v3 }
  0x20   : > { %3193 = vmatprep.subr.mxu0 %v771_v8 }
  0x21   : > { %3194 = vmatpush3.msra.mxu0 %v771_v8  ;;  %v1137_v15 = vsub.f32 %v1132_v13, %v1136_v14 }
  0x22   : > { %3196 = vmatmul.mubr.msk.f32.vlgmr.msra.gmra.mxu0 %vm775_vm0, %v774_v9  ;;  %3208 = vmatprep.subr.mxu0 %v3474_v12 }
  0x23   : > { %3210 = vmatprep.mubr.msk.f32.mxu0 %vm3475_vm2, %v3474_v12  ;;  %3209 = vmatpush3.msra.mxu0 %v1137_v15 }
  0x24   : > { %3218 = vmatprep.subr.mxu0 %v3474_v12 }
  0x26   : > { %3211 = vmatmul.mubr.msk.f32.vlgmr.msra.gmra.mxu0 %vm1139_vm3, %v1138_v16 }
  0x27   : > { %3219 = vmatpush3.msk.msra.mxu0 %vm874_vm1, %v953_v11  ;;  %3220 = vmatprep.mubr.msk.f32.mxu0 %vm3475_vm2, %v3474_v12 }
  0x28   : > { %3234 = vmatprep.subr.mxu0 %v3474_v12 }
  0xe2   : > { %v3197_v17 = vpop.f32.mrf.mxu0 }
  0xe3   : > { %v858_v20 = vsub.f32 %v772_v7, %v3197_v17 }
  0xe4   : > { %v848_v18 = vpop.f32.mrf.mxu0 }
  0xe5   : > { %v857_v19 = vsub.f32 %v771_v8, %v848_v18 }
  0xe6   : > { %v1209_v43 = vpop.f32.mrf.mxu0 }
  0xe7   : > { %3200 = vmatprep.mubr.msk.f32.mxu1 %vm867_vm4, %v857_v19  ;;  %v1213_v44 = vsub.f32 %v1137_v15, %v1209_v43  ;;  %3221 = vmatmul.mubr.msk.f32.vlgmr.msra.gmra.mxu0 %vm867_vm4, %v1209_v43 }
  0xe8   : > { %3201 = vmatmul.mubr.msk.f32.vlgmr.msra.gmra.mxu1 %vm867_vm4, %v858_v20  ;;  %v3212_v45 = vpop.f32.mrf.mxu0  ;;  %3238 = vmatprep.mubr.msk.f32.mxu0 %vm3475_vm2, %v3474_v12 }
  0xe9   : > { %3205 = vmatprep.mubr.msk.f32.mxu1 %vm867_vm4, %v848_v18  ;;  %3204 = vmatpush3.msk.msra.mxu1 %vm874_vm1, %v953_v11 }
  0xea   : > { %3213 = vmatprep.subr.mxu1 %v3474_v12 }
  0xec   : > { %3206 = vmatmul.mubr.msk.f32.vlgmr.msra.gmra.mxu1 %vm867_vm4, %v3197_v17 }
  0xed   : > { %3214 = vmatpush3.msk.msra.mxu1 %vm874_vm1, %v859_v10  ;;  %3215 = vmatprep.mubr.msk.f32.mxu1 %vm3475_vm2, %v3474_v12 }
  0xee   : > { %3223 = vmatprep.subr.mxu1 %v1406_v46 }
  0xf0   : > { %3216 = vmatmul.mubr.msk.f32.vlgmr.msra.gmra.mxu1 %vm867_vm4, %v1213_v44 }
  0xf1   : > { %3224 = vmatpush3.msra.mxu1 %v1406_v46 }
  0xf2   : > { %3225 = vmatprep.subr.mxu1 %v1405_v47 }
  0xf3   : > { %3226 = vmatpush3.msra.mxu1 %v1405_v47 }
  0xf4   : > { %3227 = vmatprep.subr.mxu1 %v1404_v48 }
  0xf5   : > { %3228 = vmatpush3.msra.mxu1 %v1404_v48 }
  0xf6   : > { %3229 = vmatprep.subr.mxu1 %v1403_v49 }
  0xf7   : > { %3230 = vmatpush3.msra.mxu1 %v1403_v49 }
  0xf8   : > { %3252 = vmatprep.subr.mxu1 %v3474_v12 }
 0x1a8   : > { %v3202_v22 = vpop.f32.mrf.mxu1 }
 0x1a9   : > { %v3673_v23 = vadd.f32 %v3202_v22, %v3670_v21 }
 0x1aa   : > { %v944_v24 = vpop.f32.mrf.mxu1 }
 0x1ab   : > { %v3681_v26 = vadd.f32 %v3670_v21, %v944_v24  ;;  %v1049_v27 = vsel %vm1045_vm5, %v3673_v23, 0.0  ;;  %v1053_v40 = vmul.f32 %v3673_v23, %v3673_v23 }
 0x1ac   : > { %1050 = vadd.xlane.f32.xlu1 %v1049_v27  ;;  %v3207_v28 = vpop.f32.mrf.mxu1 }
 0x1ad   : > { %v3686_v29 = vadd.f32 %v3207_v28, %v3678_v25  ;;  %v1046_v30 = vsel %vm1045_vm5, %v3681_v26, 0.0  ;;  %v1052_v31 = vmul.f32 %v3681_v26, %v3681_v26  ;;  %v1057_v42 = vsel %vm1045_vm5, %v1053_v40, 0.0 }
 0x1ae   : > { %v1036_v32 = vpop.f32.mrf.mxu1  ;;  %1047 = vadd.xlane.f32.xlu0 %v1046_v30 }
 0x1af   : > { %v3693_v33 = vadd.f32 %v3678_v25, %v1036_v32  ;;  %v1091_v34 = vsel %vm1045_vm5, %v3686_v29, 0.0  ;;  %v1054_v35 = vsel %vm1045_vm5, %v1052_v31, 0.0  ;;  %v1095_v38 = vmul.f32 %v3686_v29, %v3686_v29 }
 0x1b0   : > { %1092 = vadd.xlane.f32.xlu1 %v1091_v34 }
 0x1b1   : > { %v1094_v36 = vmul.f32 %v3693_v33, %v3693_v33  ;;  %v1088_v39 = vsel %vm1045_vm5, %v3693_v33, 0.0  ;;  %v1099_v41 = vsel %vm1045_vm5, %v1095_v38, 0.0 }
 0x1b2   : > { %1055 = vadd.xlane.f32.xlu0 %v1054_v35 }
 0x1b3   : > { %v1096_v37 = vsel %vm1045_vm5, %v1094_v36, 0.0 }
 0x1b4   : > { %1097 = vadd.xlane.f32.xlu1 %v1096_v37 }
 0x1b6   : > { %1089 = vadd.xlane.f32.xlu0 %v1088_v39 }
 0x1b8   : > { %1100 = vadd.xlane.f32.xlu1 %v1099_v41 }
 0x1ba   : > { %1058 = vadd.xlane.f32.xlu0 %v1057_v42 }
 0x235   : > { %v1051_v50 = vpop.xlane.xlu1 %1050 }
 0x236   : > { %v1061_v60 = vmul.f32 0.03125, %v1051_v50 }
 0x237   : > { %v1048_v51 = vpop.xlane.xlu0 %1047 }
 0x238   : > { %v1060_v52 = vmul.f32 0.03125, %v1048_v51  ;;  %v1065_v7 = vmul.f32 %v1061_v60, %v1061_v60  ;;  %v1071_v34 = vsub.f32 %v3673_v23, %v1061_v60  ;;  %v3045_v60 = vld [vmem:[%s4077_s10] ss:$0 sm:$0xff] }
 0x239   : > { %v1093_v53 = vpop.xlane.xlu1 %1092 }
 0x23a   : > { %v1064_v55 = vmul.f32 %v1060_v52, %v1060_v52  ;;  %v1103_v57 = vmul.f32 0.03125, %v1093_v53  ;;  %v1070_v20 = vsub.f32 %v3681_v26, %v1060_v52 }
 0x23b   : > { %v1056_v54 = vpop.xlane.xlu0 %1055 }
 0x23c   : > { %v1062_v56 = vmul.f32 0.03125, %v1056_v54  ;;  %v1107_v1 = vmul.f32 %v1103_v57, %v1103_v57  ;;  %v1113_v31 = vsub.f32 %v3686_v29, %v1103_v57  ;;  %v3736_v57 = vpop.f32.mrf.mxu1 }
 0x23d   : > { %v1098_v58 = vpop.xlane.xlu1 %1097 }
 0x23e   : > { %v1066_v59 = vsub.f32 %v1062_v56, %v1064_v55  ;;  %v1104_v4 = vmul.f32 0.03125, %v1098_v58  ;;  %v3734_v56 = vpop.f32.mrf.mxu0 }
 0x23f   : > { %v1090_v61 = vpop.xlane.xlu0 %1089 }
 0x240   : > { %v1068_v62 = vmax.f32 %v1066_v59, 0.0  ;;  %v1102_v63 = vmul.f32 0.03125, %v1090_v61  ;;  %v3222_v58 = vpop.f32.mrf.mxu0  ;;  %v3217_v59 = vpop.f32.mrf.mxu1 }
 0x241   : > { %v1101_v2 = vpop.xlane.xlu1 %1100 }
 0x242   : > { %v1072_v3 = vadd.f32 1e-05, %v1068_v62  ;;  %v1106_v5 = vmul.f32 %v1102_v63, %v1102_v63  ;;  %v1105_v6 = vmul.f32 0.03125, %v1101_v2  ;;  %v1112_v28 = vsub.f32 %v3693_v33, %v1102_v63 }
 0x243   : > { %v1059_v8 = vpop.xlane.xlu0 %1058 }
 0x244   : > { %3410 = vrsqrt.f32 %v1072_v3  ;;  %v1108_v9 = vsub.f32 %v1104_v4, %v1106_v5  ;;  %v1109_v10 = vsub.f32 %v1105_v6, %v1107_v1  ;;  %v1063_v11 = vmul.f32 0.03125, %v1059_v8  ;;  %v1538_v8 = vld [vmem:[%s4079_s12] sm:$0xff] }
 0x246   : > { %v1110_v13 = vmax.f32 %v1108_v9, 0.0  ;;  %v1111_v14 = vmax.f32 %v1109_v10, 0.0  ;;  %v1067_v15 = vsub.f32 %v1063_v11, %v1065_v7  ;;  %v3476_v9 = vmov 0  }
 0x247   : > { %3402 = vset.pattern.permute.xlu0 %v3476_v9  ;;  %3403 = vset.pattern.permute.xlu1 %v3476_v9 }
 0x248   : > { %v1114_v16 = vadd.f32 1e-05, %v1110_v13  ;;  %v1115_v17 = vadd.f32 1e-05, %v1111_v14  ;;  %v1069_v18 = vmax.f32 %v1067_v15, 0.0 }
 0x24a   : > { %3412 = vrsqrt.f32 %v1114_v16  ;;  %v1073_v19 = vadd.f32 1e-05, %v1069_v18 }
 0x24b   : > { %3414 = vrsqrt.f32 %v1115_v17 }
 0x24c   : > { %3416 = vrsqrt.f32 %v1073_v19 }
 0x251   : > { %v3411_v22 = vpop.eup %3410 }
 0x252   : > { %v1076_v24 = vmul.f32 %v3411_v22, %v1070_v20 }
 0x254   : > { %v1080_v27 = vmul.f32 0.70710677, %v1076_v24  ;;  %v1078_v45 = vmul.f32 0.5, %v1076_v24 }
 0x256   : > { %3418 = verf.f32 %v1080_v27 }
 0x257   : > { %v3413_v30 = vpop.eup %3412 }
 0x258   : > { %v3415_v32 = vpop.eup %3414  ;;  %v1118_v35 = vmul.f32 %v3413_v30, %v1112_v28 }
 0x259   : > { %v3417_v36 = vpop.eup %3416  ;;  %v1119_v37 = vmul.f32 %v3415_v32, %v1113_v31 }
 0x25a   : > { %v1122_v38 = vmul.f32 0.70710677, %v1118_v35  ;;  %v1077_v39 = vmul.f32 %v3417_v36, %v1071_v34  ;;  %v1120_v44 = vmul.f32 0.5, %v1118_v35 }
 0x25b   : > { %v1123_v40 = vmul.f32 0.70710677, %v1119_v37  ;;  %v1121_v23 = vmul.f32 0.5, %v1119_v37 }
 0x25c   : > { %3420 = verf.f32 %v1122_v38  ;;  %v1081_v26 = vmul.f32 0.70710677, %v1077_v39  ;;  %v1079_v50 = vmul.f32 0.5, %v1077_v39 }
 0x25d   : > { %3422 = verf.f32 %v1123_v40 }
 0x25e   : > { %3424 = verf.f32 %v1081_v26 }
 0x263   : > { %v3419_v41 = vpop.eup %3418 }
 0x264   : > { %v1084_v42 = vadd.f32 1.0, %v3419_v41 }
 0x266   : > { %v1086_v49 = vmul.f32 %v1084_v42, %v1078_v45 }
 0x269   : > { %v3421_v33 = vpop.eup %3420 }
 0x26a   : > { %v3423_v43 = vpop.eup %3422  ;;  %v1126_v29 = vadd.f32 1.0, %v3421_v33 }
 0x26b   : > { %v3425_v46 = vpop.eup %3424  ;;  %v1127_v47 = vadd.f32 1.0, %v3423_v43 }
 0x26c   : > { %v1128_v48 = vmul.f32 %v1126_v29, %v1120_v44  ;;  %v1085_v51 = vadd.f32 1.0, %v3425_v46  ;;  %v1537_v46 = vld [vmem:[%s4078_s11] sm:$0xff] }
 0x26d   : > { %v1129_v54 = vmul.f32 %v1127_v47, %v1121_v23  ;;  %v1649_v23 = vld [vmem:[%s4080_s13 + $0x18] sm:$0xff]  ;;  %v1648_v47 = vld [vmem:[%s4080_s13 + $0x10] sm:$0xff] }
 0x26e   : > { %v1130_v52 = vadd.f32 %v1128_v48, %v1086_v49  ;;  %v1087_v53 = vmul.f32 %v1085_v51, %v1079_v50  ;;  %v1647_v48 = vld [vmem:[%s4080_s13 + $0x8] sm:$0xff]  ;;  %v1646_v49 = vld [vmem:[%s4080_s13] sm:$0xff] }
 0x270   : > { %3231 = vmatprep.mubr.msk.f32.mxu1 %vm1045_vm5, %v1130_v52  ;;  %v1131_v55 = vadd.f32 %v1129_v54, %v1087_v53 }
 0x272   : > { %3232 = vmatmul.mubr.msk.f32.vlgmr.msra.gmra.mxu1 %vm1045_vm5, %v1131_v55 }
 0x273   : > { %3254 = vmatprep.mubr.msk.f32.mxu1 %vm3475_vm2, %v3474_v12 }
 0x332   : > { %v3233_v61 = vpop.f32.mrf.mxu1 }
 0x333   : > { %v1492_v62 = vadd.f32 %v3233_v61, %v3045_v60 }
 0x334   : > { %v1486_v63 = vpop.f32.mrf.mxu1 }
 0x335   : > { %v1487_v1 = vadd.f32 %v3045_v60, %v1486_v63  ;;  %v1498_v2 = vsel %vm1045_vm5, %v1492_v62, 0.0  ;;  %v1502_v3 = vmul.f32 %v1492_v62, %v1492_v62 }
 0x336   : > { %1499 = vadd.xlane.f32.xlu0 %v1498_v2 }
 0x337   : > { %v1495_v4 = vsel %vm1045_vm5, %v1487_v1, 0.0  ;;  %v1501_v5 = vmul.f32 %v1487_v1, %v1487_v1  ;;  %v1506_v6 = vsel %vm1045_vm5, %v1502_v3, 0.0 }
 0x338   : > { %1496 = vadd.xlane.f32.xlu1 %v1495_v4 }
 0x339   : > { %v1503_v7 = vsel %vm1045_vm5, %v1501_v5, 0.0 }
 0x33a   : > { %1507 = vadd.xlane.f32.xlu0 %v1506_v6 }
 0x33c   : > { %1504 = vadd.xlane.f32.xlu1 %v1503_v7 }
 0x350   : > { %1541 = vperm.xlu0 %3402, %v1538_v8  }
 0x3bf   : > { %v1500_v10 = vpop.xlane.xlu0 %1499 }
 0x3c0   : > { %v1510_v11 = vmul.f32 0.03125, %v1500_v10 }
 0x3c1   : > { %v1497_v13 = vpop.xlane.xlu1 %1496 }
 0x3c2   : > { %v1509_v14 = vmul.f32 0.03125, %v1497_v13  ;;  %v1514_v16 = vmul.f32 %v1510_v11, %v1510_v11  ;;  %v1520_v32 = vsub.f32 %v1492_v62, %v1510_v11 }
 0x3c3   : > { %v1508_v15 = vpop.xlane.xlu0 %1507 }
 0x3c4   : > { %v1512_v17 = vmul.f32 0.03125, %v1508_v15  ;;  %v1513_v19 = vmul.f32 %v1509_v14, %v1509_v14  ;;  %v1519_v35 = vsub.f32 %v1487_v1, %v1509_v14 }
 0x3c5   : > { %v1505_v18 = vpop.xlane.xlu1 %1504 }
 0x3c6   : > { %v1516_v20 = vsub.f32 %v1512_v17, %v1514_v16  ;;  %v1511_v22 = vmul.f32 0.03125, %v1505_v18 }
 0x3c8   : > { %v1518_v24 = vmax.f32 %v1516_v20, 0.0  ;;  %v1515_v27 = vsub.f32 %v1511_v22, %v1513_v19 }
 0x3ca   : > { %v1522_v28 = vadd.f32 1e-05, %v1518_v24  ;;  %v1517_v30 = vmax.f32 %v1515_v27, 0.0 }
 0x3cb   : > { %v1542_v50 = vpop.permute.xlu0 %1541 }
 0x3cc   : > { %3426 = vrsqrt.f32 %v1522_v28  ;;  %v1521_v31 = vadd.f32 1e-05, %v1517_v30  ;;  %v3049_v28 = vld [vmem:[%s4081_s14] ss:$0 sm:$0xff] }
 0x3ce   : > { %3428 = vrsqrt.f32 %v1521_v31 }
 0x3d9   : > { %v3427_v34 = vpop.eup %3426 }
 0x3da   : > { %v1526_v36 = vmul.f32 %v3427_v34, %v1520_v32 }
 0x3db   : > { %v3429_v37 = vpop.eup %3428 }
 0x3dc   : > { %v1530_v38 = vmul.f32 0.70710677, %v1526_v36  ;;  %v1525_v39 = vmul.f32 %v3429_v37, %v1519_v35  ;;  %v1528_v41 = vmul.f32 0.5, %v1526_v36  ;;  %v1752_v37 = vld [vmem:[%s4083_s16] sm:$0xf] }
 0x3de   : > { %3430 = verf.f32 %v1530_v38  ;;  %v1529_v40 = vmul.f32 0.70710677, %v1525_v39  ;;  %v1527_v44 = vmul.f32 0.5, %v1525_v39 }
 0x3e0   : > { %3432 = verf.f32 %v1529_v40 }
 0x3eb   : > { %v3431_v26 = vpop.eup %3430 }
 0x3ec   : > { %v1534_v42 = vadd.f32 1.0, %v3431_v26 }
 0x3ed   : > { %v3433_v33 = vpop.eup %3432 }
 0x3ee   : > { %v1536_v43 = vmul.f32 %v1534_v42, %v1528_v41  ;;  %v1533_v29 = vadd.f32 1.0, %v3433_v33 }
 0x3f0   : > { %3235 = vmatpush3.msra.mxu0 %v1536_v43  ;;  %v1535_v45 = vmul.f32 %v1533_v29, %v1527_v44 }
 0x3f1   : > { %3236 = vmatprep.subr.mxu0 %v3474_v12 }
 0x3f2   : > { %3237 = vmatpush3.msra.mxu0 %v1535_v45 }
 0x3f3   : > { %3239 = vmatmul.mubr.msk.f32.vlgmr.msra.gmra.mxu0 %vm775_vm0, %v1537_v46  ;;  %3241 = vmatprep.subr.mxu0 %v3474_v12 }
 0x3f4   : > { %3249 = vmatprep.mubr.msk.f32.mxu0 %vm3475_vm2, %v3474_v12  ;;  %3242 = vmatpush3.msra.mxu0 %v1649_v23 }
 0x3f5   : > { %3243 = vmatprep.subr.mxu0 %v3474_v12 }
 0x3f6   : > { %3244 = vmatpush3.msra.mxu0 %v1648_v47 }
 0x3f7   : > { %3245 = vmatprep.subr.mxu0 %v3474_v12 }
 0x3f8   : > { %3246 = vmatpush3.msra.mxu0 %v1647_v48 }
 0x3f9   : > { %3247 = vmatprep.subr.mxu0 %v3474_v12 }
 0x3fa   : > { %3248 = vmatpush3.msra.mxu0 %v1646_v49 }
 0x3fb   : > { %3268 = vmatprep.subr.mxu0 %v3474_v12 }
 0x4b3   : > { %v1613_v51 = vpop.f32.mrf.mxu0 }
 0x4b4   : > { %v1614_v52 = vadd.f32 %v1613_v51, %v1542_v50  ;;  %v1751_v50 = vld [vmem:[%s4082_s15] sm:$0xf]  ;;  %v1864_v51 = vld [vmem:[%s4084_s17 + $0x18] sm:$0xff] }
 0x4b5   : > { %v3240_v53 = vpop.f32.mrf.mxu0 }
 0x4b6   : > { %v1617_v54 = vsel %vm1045_vm5, %v1614_v52, 0.0  ;;  %v1624_v55 = vmul.f32 %v1614_v52, %v1614_v52  ;;  %v1862_v53 = vld [vmem:[%s4084_s17 + $0x8] sm:$0xff] }
 0x4b7   : > { %v1618_v58 = vrot.slane %v1617_v54, 4 }
 0x4b8   : > { %v1625_v59 = vsel %vm1045_vm5, %v1624_v55, 0.0 }
 0x4b9   : > { %v1619_v60 = vadd.f32 %v1618_v58, %v1617_v54  ;;  %v1626_v61 = vrot.slane %v1625_v59, 4  ;;  %v1861_v54 = vld [vmem:[%s4084_s17] sm:$0xff] }
 0x4bb   : > { %v1620_v62 = vrot.slane %v1619_v60, 2  ;;  %v1627_v63 = vadd.f32 %v1626_v61, %v1625_v59 }
 0x4bd   : > { %v1621_v1 = vadd.f32 %v1620_v62, %v1619_v60  ;;  %v1628_v2 = vrot.slane %v1627_v63, 2 }
 0x4bf   : > { %v1622_v3 = vrot.slane %v1621_v1, 1  ;;  %v1629_v4 = vadd.f32 %v1628_v2, %v1627_v63 }
 0x4c1   : > { %v1623_v5 = vadd.f32 %v1622_v3, %v1621_v1  ;;  %v1630_v6 = vrot.slane %v1629_v4, 1 }
 0x4c3   : > { %v1631_v7 = vadd.f32 %v1630_v6, %v1629_v4  ;;  %v1632_v8 = vmul.f32 0.125, %v1623_v5 }
 0x4c5   : > { %v1633_v10 = vmul.f32 0.125, %v1631_v7  ;;  %v1634_v11 = vmul.f32 %v1632_v8, %v1632_v8  ;;  %v1637_v16 = vsub.f32 %v1614_v52, %v1632_v8  ;;  %v1863_v52 = vld [vmem:[%s4084_s17 + $0x10] sm:$0xff] }
 0x4c7   : > { %v1635_v13 = vsub.f32 %v1633_v10, %v1634_v11 }
 0x4c9   : > { %v1636_v14 = vmax.f32 %v1635_v13, 0.0 }
 0x4cb   : > { %v1638_v15 = vadd.f32 1e-05, %v1636_v14 }
 0x4cd   : > { %3434 = vrsqrt.f32 %v1638_v15 }
 0x4da   : > { %v3435_v17 = vpop.eup %3434 }
 0x4db   : > { %v1640_v18 = vmul.f32 %v3435_v17, %v1637_v16 }
 0x4dd   : > { %v1642_v19 = vmul.f32 0.70710677, %v1640_v18  ;;  %v1641_v22 = vmul.f32 0.5, %v1640_v18 }
 0x4df   : > { %3436 = verf.f32 %v1642_v19 }
 0x4ec   : > { %v3437_v20 = vpop.eup %3436 }
 0x4ed   : > { %v1644_v24 = vadd.f32 1.0, %v3437_v20 }
 0x4ef   : > { %v1645_v27 = vmul.f32 %v1644_v24, %v1641_v22 }
 0x4f1   : > { %3250 = vmatmul.mubr.msk.f32.vlgmr.msra.gmra.mxu0 %vm1045_vm5, %v1645_v27 }
 0x4f2   : > { %3270 = vmatprep.mubr.msk.f32.mxu0 %vm3475_vm2, %v3474_v12 }
 0x5b1   : > { %v1726_v30 = vpop.f32.mrf.mxu0 }
 0x5b2   : > { %v1727_v31 = vadd.f32 %v3049_v28, %v1726_v30 }
 0x5b3   : > { %v3251_v32 = vpop.f32.mrf.mxu0 }
 0x5b4   : > { %v1730_v34 = vsel %vm1045_vm5, %v1727_v31, 0.0  ;;  %v1733_v35 = vmul.f32 %v1727_v31, %v1727_v31 }
 0x5b5   : > { %1731 = vadd.xlane.f32.xlu1 %v1730_v34 }
 0x5b6   : > { %v1734_v36 = vsel %vm1045_vm5, %v1733_v35, 0.0  ;;  %v3052_v35 = vld [vmem:[%s4085_s18] ss:$0 sm:$0xff] }
 0x5b9   : > { %1735 = vadd.xlane.f32.xlu1 %v1734_v36 }
 0x5ca   : > { %1755 = vperm.xlu1 %3403, %v1752_v37  }
 0x63e   : > { %v1732_v38 = vpop.xlane.xlu1 %1731 }
 0x63f   : > { %v1737_v39 = vmul.f32 0.03125, %v1732_v38 }
 0x641   : > { %v1739_v26 = vmul.f32 %v1737_v39, %v1737_v39  ;;  %v1742_v44 = vsub.f32 %v1727_v31, %v1737_v39 }
 0x642   : > { %v1736_v40 = vpop.xlane.xlu1 %1735 }
 0x643   : > { %v1738_v41 = vmul.f32 0.03125, %v1736_v40 }
 0x645   : > { %v1740_v42 = vsub.f32 %v1738_v41, %v1739_v26  ;;  %v3821_v26 = vadd.f32 %v3670_v21, %v3736_v57 }
 0x646   : > { %v1756_v55 = vpop.permute.xlu1 %1755 }
 0x647   : > { %v1741_v33 = vmax.f32 %v1740_v42, 0.0  ;;  %v3826_v42 = vadd.f32 %v3678_v25, %v3734_v56  ;;  %v1967_v25 = vld [vmem:[%s4087_s20] sm:$0x3] }
 0x649   : > { %v1743_v43 = vadd.f32 1e-05, %v1741_v33  ;;  %v1360_v33 = vsel %vm1045_vm5, %v3821_v26, 0.0  ;;  %v1384_v21 = vmul.f32 %v3826_v42, %v3826_v42  ;;  %v1381_v56 = vsel %vm1045_vm5, %v3826_v42, 0.0 }
 0x64b   : > { %3438 = vrsqrt.f32 %v1743_v43  ;;  %v1363_v43 = vmul.f32 %v3821_v26, %v3821_v26  ;;  %v1385_v57 = vsel %vm1045_vm5, %v1384_v21, 0.0 }
 0x658   : > { %v3439_v29 = vpop.eup %3438 }
 0x659   : > { %v1745_v45 = vmul.f32 %v3439_v29, %v1742_v44  ;;  %v1364_v44 = vsel %vm1045_vm5, %v1363_v43, 0.0 }
 0x65b   : > { %v1747_v46 = vmul.f32 0.70710677, %v1745_v45  ;;  %v1746_v47 = vmul.f32 0.5, %v1745_v45 }
 0x65d   : > { %3440 = verf.f32 %v1747_v46 }
 0x66a   : > { %v3441_v23 = vpop.eup %3440 }
 0x66b   : > { %v1749_v48 = vadd.f32 1.0, %v3441_v23 }
 0x66d   : > { %v1750_v49 = vmul.f32 %v1749_v48, %v1746_v47 }
 0x66f   : > { %3253 = vmatpush3.msra.mxu1 %v1750_v49 }
 0x670   : > { %3255 = vmatmul.mubr.msk.f32.vlgmr.msra.gmra.mxu1 %vm1139_vm3, %v1751_v50  ;;  %3257 = vmatprep.subr.mxu1 %v3474_v12 }
 0x671   : > { %3265 = vmatprep.mubr.msk.f32.mxu1 %vm3475_vm2, %v3474_v12  ;;  %3258 = vmatpush3.msra.mxu1 %v1864_v51 }
 0x672   : > { %3259 = vmatprep.subr.mxu1 %v3474_v12 }
 0x673   : > { %3260 = vmatpush3.msra.mxu1 %v1863_v52 }
 0x674   : > { %3261 = vmatprep.subr.mxu1 %v3474_v12 }
 0x675   : > { %3262 = vmatpush3.msra.mxu1 %v1862_v53 }
 0x676   : > { %3263 = vmatprep.subr.mxu1 %v3474_v12 }
 0x677   : > { %3264 = vmatpush3.msra.mxu1 %v1861_v54 }
 0x678   : > { %3284 = vmatprep.subr.mxu1 %v3474_v12 }
 0x730   : > { %v1827_v58 = vpop.f32.mrf.mxu1 }
 0x731   : > { %v1828_v59 = vadd.f32 %v1827_v58, %v1756_v55 }
 0x732   : > { %v3256_v60 = vpop.f32.mrf.mxu1 }
 0x733   : > { %v1832_v61 = vsel %vm1831_vm6, %v1828_v59, 0.0  ;;  %v1839_v62 = vmul.f32 %v1828_v59, %v1828_v59 }
 0x734   : > { %v1833_v63 = vrot.slane %v1832_v61, 4 }
 0x735   : > { %v1840_v1 = vsel %vm1831_vm6, %v1839_v62, 0.0  ;;  %v2083_v62 = vld [vmem:[%s4088_s21 + $0x18] sm:$0xff] }
 0x736   : > { %v1834_v2 = vadd.f32 %v1833_v63, %v1832_v61  ;;  %v1841_v3 = vrot.slane %v1840_v1, 4  ;;  %v1966_v61 = vld [vmem:[%s4086_s19] sm:$0x3]  ;;  %v2082_v63 = vld [vmem:[%s4088_s21 + $0x10] sm:$0xff] }
 0x738   : > { %v1835_v4 = vrot.slane %v1834_v2, 2  ;;  %v1842_v5 = vadd.f32 %v1841_v3, %v1840_v1  ;;  %v3060_v1 = vld [vmem:[%s4088_s21 + $0x38] sm:$0xff]  ;;  %v3059_v3 = vld [vmem:[%s4088_s21 + $0x30] sm:$0xff] }
 0x73a   : > { %v1836_v6 = vadd.f32 %v1835_v4, %v1834_v2  ;;  %v1843_v7 = vrot.slane %v1842_v5, 2  ;;  %v2081_v2 = vld [vmem:[%s4088_s21 + $0x8] sm:$0xff]  ;;  %v2080_v4 = vld [vmem:[%s4088_s21] sm:$0xff] }
 0x73c   : > { %v1837_v8 = vrot.slane %v1836_v6, 1  ;;  %v1844_v10 = vadd.f32 %v1843_v7, %v1842_v5  ;;  %v3058_v5 = vld [vmem:[%s4088_s21 + $0x28] sm:$0xff] }
 0x73e   : > { %v1838_v11 = vadd.f32 %v1837_v8, %v1836_v6  ;;  %v1845_v13 = vrot.slane %v1844_v10, 1  ;;  %v3057_v6 = vld [vmem:[%s4088_s21 + $0x20] sm:$0xff] }
 0x740   : > { %v1846_v14 = vadd.f32 %v1845_v13, %v1844_v10  ;;  %v1847_v15 = vmul.f32 0.25, %v1838_v11 }
 0x742   : > { %v1848_v16 = vmul.f32 0.25, %v1846_v14  ;;  %v1849_v17 = vmul.f32 %v1847_v15, %v1847_v15  ;;  %v1852_v22 = vsub.f32 %v1828_v59, %v1847_v15 }
 0x744   : > { %v1850_v18 = vsub.f32 %v1848_v16, %v1849_v17 }
 0x746   : > { %v1851_v19 = vmax.f32 %v1850_v18, 0.0 }
 0x748   : > { %v1853_v20 = vadd.f32 1e-05, %v1851_v19 }
 0x74a   : > { %3442 = vrsqrt.f32 %v1853_v20 }
 0x757   : > { %v3443_v24 = vpop.eup %3442 }
 0x758   : > { %v1855_v27 = vmul.f32 %v3443_v24, %v1852_v22 }
 0x75a   : > { %v1857_v28 = vmul.f32 0.70710677, %v1855_v27  ;;  %v1856_v31 = vmul.f32 0.5, %v1855_v27 }
 0x75c   : > { %3444 = verf.f32 %v1857_v28 }
 0x769   : > { %v3445_v30 = vpop.eup %3444 }
 0x76a   : > { %v1859_v32 = vadd.f32 1.0, %v3445_v30 }
 0x76c   : > { %v1860_v34 = vmul.f32 %v1859_v32, %v1856_v31 }
 0x76e   : > { %3266 = vmatmul.mubr.msk.f32.vlgmr.msra.gmra.mxu1 %vm1045_vm5, %v1860_v34 }
 0x76f   : > { %3292 = vmatprep.mubr.msk.f32.mxu1 %vm3475_vm2, %v3474_v12  ;;  %3285 = vmatpush3.msra.mxu1 %v3060_v1 }
 0x770   : > { %3286 = vmatprep.subr.mxu1 %v3474_v12 }
 0x771   : > { %3287 = vmatpush3.msra.mxu1 %v3059_v3 }
 0x772   : > { %3288 = vmatprep.subr.mxu1 %v3474_v12 }
 0x773   : > { %3289 = vmatpush3.msra.mxu1 %v3058_v5 }
 0x774   : > { %3290 = vmatprep.subr.mxu1 %v3474_v12 }
 0x775   : > { %3291 = vmatpush3.msra.mxu1 %v3057_v6 }
 0x776   : > { %3306 = vmatprep.subr.mxu1 %v3474_v12 }
 0x82e   : > { %v1941_v36 = vpop.f32.mrf.mxu1 }
 0x82f   : > { %v1942_v37 = vadd.f32 %v3052_v35, %v1941_v36 }
 0x830   : > { %v3267_v38 = vpop.f32.mrf.mxu1 }
 0x831   : > { %v1945_v39 = vsel %vm1831_vm6, %v1942_v37, 0.0  ;;  %v1948_v40 = vmul.f32 %v1942_v37, %v1942_v37 }
 0x832   : > { %1946 = vadd.xlane.f32.xlu1 %v1945_v39 }
 0x833   : > { %v1949_v41 = vsel %vm1831_vm6, %v1948_v40, 0.0 }
 0x834   : > { %1950 = vadd.xlane.f32.xlu0 %v1949_v41 }
 0x838   : > { %1361 = vadd.xlane.f32.xlu0 %v1360_v33 }
 0x83c   : > { %1365 = vadd.xlane.f32.xlu0 %v1364_v44 }
 0x840   : > { %1386 = vadd.xlane.f32.xlu0 %v1385_v57 }
 0x843   : > { %1970 = vperm.xlu1 %3403, %v1967_v25  }
 0x867   : > { %1382 = vadd.xlane.f32.xlu1 %v1381_v56 }
 0x8bb   : > { %v1947_v29 = vpop.xlane.xlu1 %1946 }
 0x8bc   : > { %v1952_v45 = vmul.f32 0.03125, %v1947_v29 }
 0x8bd   : > { %v1951_v46 = vpop.xlane.xlu0 %1950 }
 0x8be   : > { %v1954_v23 = vmul.f32 %v1952_v45, %v1952_v45  ;;  %v1953_v47 = vmul.f32 0.03125, %v1951_v46  ;;  %v1957_v51 = vsub.f32 %v1942_v37, %v1952_v45 }
 0x8bf   : > { %v1971_v8 = vpop.permute.xlu1 %1970 }
 0x8c0   : > { %v1955_v48 = vsub.f32 %v1953_v47, %v1954_v23 }
 0x8c1   : > { %v1362_v7 = vpop.xlane.xlu0 %1361 }
 0x8c2   : > { %v1956_v49 = vmax.f32 %v1955_v48, 0.0  ;;  %v1367_v15 = vmul.f32 0.03125, %v1362_v7 }
 0x8c4   : > { %v1958_v50 = vadd.f32 1e-05, %v1956_v49  ;;  %v1369_v28 = vmul.f32 %v1367_v15, %v1367_v15 }
 0x8c5   : > { %v1366_v10 = vpop.xlane.xlu0 %1365 }
 0x8c6   : > { %3446 = vrsqrt.f32 %v1958_v50  ;;  %v1368_v19 = vmul.f32 0.03125, %v1366_v10 }
 0x8c8   : > { %v1370_v34 = vsub.f32 %v1368_v19, %v1369_v28  ;;  %v2267_v19 = vld [vmem:[%s4090_s23 + $0x10] sm:$0xff]  ;;  %v3072_v28 = vld [vmem:[%s4090_s23 + $0x58] sm:$0xff] }
 0x8c9   : > { %v1387_v14 = vpop.xlane.xlu0 %1386 }
 0x8ca   : > { %v1389_v20 = vmul.f32 0.03125, %v1387_v14  ;;  %v1371_v40 = vmax.f32 %v1370_v34, 0.0  ;;  %v3076_v34 = vld [vmem:[%s4090_s23 + $0x70] sm:$0xff] }
 0x8cc   : > { %v1373_v57 = vadd.f32 1e-05, %v1371_v40 }
 0x8d3   : > { %v3447_v52 = vpop.eup %3446 }
 0x8d4   : > { %v1960_v53 = vmul.f32 %v3447_v52, %v1957_v51 }
 0x8d6   : > { %v1962_v54 = vmul.f32 0.70710677, %v1960_v53  ;;  %v1961_v58 = vmul.f32 0.5, %v1960_v53  ;;  %v1372_v53 = vsub.f32 %v3821_v26, %v1367_v15  ;;  %v3065_v15 = vld [vmem:[%s4090_s23 + $0x30] sm:$0xff] }
 0x8d8   : > { %3448 = verf.f32 %v1962_v54 }
 0x8e5   : > { %v3449_v55 = vpop.eup %3448 }
 0x8e6   : > { %v1964_v59 = vadd.f32 1.0, %v3449_v55 }
 0x8e8   : > { %v1965_v60 = vmul.f32 %v1964_v59, %v1961_v58 }
 0x8ea   : > { %3269 = vmatpush3.msk.msra.mxu0 %vm874_vm1, %v1965_v60 }
 0x8eb   : > { %3271 = vmatmul.mubr.msk.f32.vlgmr.msra.gmra.mxu0 %vm867_vm4, %v1966_v61  ;;  %3273 = vmatprep.subr.mxu0 %v3474_v12 }
 0x8ec   : > { %3281 = vmatprep.mubr.msk.f32.mxu0 %vm3475_vm2, %v3474_v12  ;;  %3274 = vmatpush3.msra.mxu0 %v2083_v62 }
 0x8ed   : > { %3275 = vmatprep.subr.mxu0 %v3474_v12 }
 0x8ee   : > { %3276 = vmatpush3.msra.mxu0 %v2082_v63 }
 0x8ef   : > { %3277 = vmatprep.subr.mxu0 %v3474_v12 }
 0x8f0   : > { %3278 = vmatpush3.msra.mxu0 %v2081_v2  ;;  %v1383_v11 = vpop.xlane.xlu1 %1382 }
 0x8f1   : > { %3279 = vmatprep.subr.mxu0 %v3474_v12  ;;  %v1388_v13 = vmul.f32 0.03125, %v1383_v11  ;;  %v3066_v11 = vld [vmem:[%s4090_s23 + $0x38] sm:$0xff] }
 0x8f2   : > { %3280 = vmatpush3.msra.mxu0 %v2080_v4 }
 0x8f3   : > { %3295 = vmatprep.subr.mxu0 %v3474_v12  ;;  %v1390_v16 = vmul.f32 %v1388_v13, %v1388_v13  ;;  %v1393_v51 = vsub.f32 %v3826_v42, %v1388_v13 }
 0x8f5   : > { %v1391_v30 = vsub.f32 %v1389_v20, %v1390_v16  ;;  %v2268_v16 = vld [vmem:[%s4090_s23 + $0x18] sm:$0xff]  ;;  %v3063_v20 = vld [vmem:[%s4090_s23 + $0x20] sm:$0xff] }
 0x8f7   : > { %v1392_v37 = vmax.f32 %v1391_v30, 0.0  ;;  %v3071_v30 = vld [vmem:[%s4090_s23 + $0x50] sm:$0xff] }
 0x8f9   : > { %v1394_v43 = vadd.f32 1e-05, %v1392_v37 }
 0x8fb   : > { %3450 = vrsqrt.f32 %v1394_v43  ;;  %v3080_v43 = vld [vmem:[%s4090_s23 + $0x88] sm:$0xff] }
 0x8fc   : > { %3452 = vrsqrt.f32 %v1373_v57  ;;  %v3085_v57 = vld [vmem:[%s4090_s23 + $0xa8] sm:$0xff] }
 0x908   : > { %v3451_v50 = vpop.eup %3450 }
 0x909   : > { %v3453_v52 = vpop.eup %3452  ;;  %v1396_v54 = vmul.f32 %v3451_v50, %v1393_v51  ;;  %v3095_v50 = vld [vmem:[%s4090_s23 + $0xe8] sm:$0xff] }
 0x90a   : > { %v1375_v55 = vmul.f32 %v3453_v52, %v1372_v53  ;;  %v3094_v52 = vld [vmem:[%s4090_s23 + $0xe0] sm:$0xff] }
 0x90b   : > { %v1398_v58 = vmul.f32 0.70710677, %v1396_v54  ;;  %v1397_v42 = vmul.f32 0.5, %v1396_v54  ;;  %v2079_v54 = vld [vmem:[%s4089_s22] sm:$0x1] }
 0x90c   : > { %v1377_v59 = vmul.f32 0.70710677, %v1375_v55  ;;  %v1376_v26 = vmul.f32 0.5, %v1375_v55 }
 0x9ab   : > { %v2045_v17 = vpop.f32.mrf.mxu0 }
 0x9ac   : > { %v2046_v18 = vadd.f32 %v2045_v17, %v1971_v8 }
 0x9ad   : > { %v3272_v22 = vpop.f32.mrf.mxu0 }
 0x9ae   : > { %v2050_v24 = vsel %vm2049_vm7, %v2046_v18, 0.0  ;;  %v2057_v27 = vmul.f32 %v2046_v18, %v2046_v18  ;;  %v2266_v22 = vld [vmem:[%s4090_s23 + $0x8] sm:$0xff] }
 0x9af   : > { %v2051_v31 = vrot.slane %v2050_v24, 4 }
 0x9b0   : > { %v2058_v32 = vsel %vm2049_vm7, %v2057_v27, 0.0  ;;  %v2265_v27 = vld [vmem:[%s4090_s23] sm:$0xff] }
 0x9b1   : > { %v2052_v35 = vadd.f32 %v2051_v31, %v2050_v24  ;;  %v2059_v36 = vrot.slane %v2058_v32, 4  ;;  %v3077_v31 = vld [vmem:[%s4090_s23 + $0x78] sm:$0xff] }
 0x9b3   : > { %v2053_v38 = vrot.slane %v2052_v35, 2  ;;  %v2060_v39 = vadd.f32 %v2059_v36, %v2058_v32  ;;  %v3070_v32 = vld [vmem:[%s4090_s23 + $0x48] sm:$0xff] }
 0x9b4   : > { %v3075_v36 = vld [vmem:[%s4090_s23 + $0x68] sm:$0xff] }
 0x9b5   : > { %v2054_v41 = vadd.f32 %v2053_v38, %v2052_v35  ;;  %v2061_v33 = vrot.slane %v2060_v39, 2  ;;  %v3069_v35 = vld [vmem:[%s4090_s23 + $0x40] sm:$0xff] }
 0x9b6   : > { %v3074_v38 = vld [vmem:[%s4090_s23 + $0x60] sm:$0xff] }
 0x9b7   : > { %v2055_v44 = vrot.slane %v2054_v41, 1  ;;  %v2062_v21 = vadd.f32 %v2061_v33, %v2060_v39  ;;  %v3082_v39 = vld [vmem:[%s4090_s23 + $0x98] sm:$0xff] }
 0x9b8   : > { %v3087_v33 = vld [vmem:[%s4090_s23 + $0xb8] sm:$0xff] }
 0x9b9   : > { %v2056_v25 = vadd.f32 %v2055_v44, %v2054_v41  ;;  %v2063_v56 = vrot.slane %v2062_v21, 1  ;;  %v3081_v41 = vld [vmem:[%s4090_s23 + $0x90] sm:$0xff] }
 0x9ba   : > { %v3086_v44 = vld [vmem:[%s4090_s23 + $0xb0] sm:$0xff] }
 0x9bb   : > { %v2064_v29 = vadd.f32 %v2063_v56, %v2062_v21  ;;  %v2065_v45 = vmul.f32 0.5, %v2056_v25  ;;  %v3079_v21 = vld [vmem:[%s4090_s23 + $0x80] sm:$0xff] }
 0x9bc   : > { %v3084_v56 = vld [vmem:[%s4090_s23 + $0xa0] sm:$0xff] }
 0x9bd   : > { %v2066_v46 = vmul.f32 0.5, %v2064_v29  ;;  %v2067_v23 = vmul.f32 %v2065_v45, %v2065_v45  ;;  %v2070_v60 = vsub.f32 %v2046_v18, %v2065_v45  ;;  %v3064_v18 = vld [vmem:[%s4090_s23 + $0x28] sm:$0xff]  ;;  %v3092_v29 = vld [vmem:[%s4090_s23 + $0xd8] sm:$0xff] }
 0x9bf   : > { %v2068_v47 = vsub.f32 %v2066_v46, %v2067_v23  ;;  %v3091_v46 = vld [vmem:[%s4090_s23 + $0xd0] sm:$0xff]  ;;  %v3097_v23 = vld [vmem:[%s4090_s23 + $0xf8] sm:$0xff] }
 0x9c1   : > { %v2069_v48 = vmax.f32 %v2068_v47, 0.0  ;;  %v3090_v47 = vld [vmem:[%s4090_s23 + $0xc8] sm:$0xff] }
 0x9c3   : > { %v2071_v49 = vadd.f32 1e-05, %v2069_v48  ;;  %v3096_v48 = vld [vmem:[%s4090_s23 + $0xf0] sm:$0xff] }
 0x9c5   : > { %3454 = vrsqrt.f32 %v2071_v49  ;;  %v3089_v49 = vld [vmem:[%s4090_s23 + $0xc0] sm:$0xff] }
 0x9c6   : > { %3456 = verf.f32 %v1398_v58 }
 0x9c7   : > { %3458 = verf.f32 %v1377_v59 }
 0x9d2   : > { %v3455_v61 = vpop.eup %3454 }
 0x9d3   : > { %v2073_v62 = vmul.f32 %v3455_v61, %v2070_v60  ;;  %v3457_v1 = vpop.eup %3456  ;;  %v2237_v61 = vld [vmem:[%s761_s27] sm:$0x1] }
 0x9d4   : > { %v3459_v2 = vpop.eup %3458  ;;  %v1400_v3 = vadd.f32 1.0, %v3457_v1 }
 0x9d5   : > { %v2075_v63 = vmul.f32 0.70710677, %v2073_v62  ;;  %v1379_v5 = vadd.f32 1.0, %v3459_v2  ;;  %v2074_v6 = vmul.f32 0.5, %v2073_v62 }
 0x9d6   : > { %v1401_v8 = vmul.f32 %v1400_v3, %v1397_v42 }
 0x9d7   : > { %3460 = verf.f32 %v2075_v63  ;;  %v1380_v13 = vmul.f32 %v1379_v5, %v1376_v26 }
 0x9d9   : > { %v3895_v17 = vadd.f32 %v1401_v8, %v1380_v13 }
 0x9db   : > { %v2275_v24 = vrot.slane %v3895_v17, 1  ;;  %v2425_v37 = vrot.slane %v3895_v17, 2  ;;  %v2504_v40 = vrot.slane %v3895_v17, 3  ;;  %v2583_v25 = vrot.slane %v3895_v17, 4 }
 0x9dc   : > { %v2662_v45 = vrot.slane %v3895_v17, 5  ;;  %v2741_v51 = vrot.slane %v3895_v17, 6  ;;  %v2820_v53 = vrot.slane %v3895_v17, 7 }
 0x9e4   : > { %v3461_v4 = vpop.eup %3460 }
 0x9e5   : > { %v2077_v7 = vadd.f32 1.0, %v3461_v4 }
 0x9e7   : > { %v2078_v10 = vmul.f32 %v2077_v7, %v2074_v6 }
 0x9e9   : > { %3282 = vmatmul.mubr.msk.f32.vlgmr.msra.gmra.mxu0 %vm1045_vm5, %v2078_v10  ;;  %v2163_v14 = vrot.slane %v2078_v10, 1 }
 0x9ea   : > { %3296 = vmatpush3.msra.mxu0 %v3066_v11  ;;  %3303 = vmatprep.mubr.msk.f32.mxu0 %vm3475_vm2, %v3474_v12 }
 0x9eb   : > { %3297 = vmatprep.subr.mxu0 %v3474_v12  ;;  %3293 = vmatmul.mubr.msk.f32.vlgmr.msra.gmra.mxu1 %vm1045_vm5, %v2163_v14 }
 0x9ec   : > { %3298 = vmatpush3.msra.mxu0 %v3065_v15  ;;  %3307 = vmatpush3.msra.mxu1 %v2268_v16 }
 0x9ed   : > { %3299 = vmatprep.subr.mxu0 %v3474_v12  ;;  %3308 = vmatprep.subr.mxu1 %v3474_v12 }
 0x9ee   : > { %3300 = vmatpush3.msra.mxu0 %v3064_v18  ;;  %3309 = vmatpush3.msra.mxu1 %v2267_v19 }
 0x9ef   : > { %3301 = vmatprep.subr.mxu0 %v3474_v12  ;;  %3310 = vmatprep.subr.mxu1 %v3474_v12 }
 0x9f0   : > { %3302 = vmatpush3.msra.mxu0 %v3063_v20  ;;  %3311 = vmatpush3.msra.mxu1 %v2266_v22 }
 0x9f1   : > { %3304 = vmatmul.mubr.msk.f32.vlgmr.msra.gmra.mxu0 %vm1045_vm5, %v2275_v24  ;;  %3312 = vmatprep.subr.mxu1 %v3474_v12 }
 0x9f2   : > { %3317 = vmatprep.subr.mxu0 %v3474_v12  ;;  %3313 = vmatpush3.msra.mxu1 %v2265_v27 }
 0x9f3   : > { %3314 = vmatprep.mubr.msk.f32.mxu1 %vm3475_vm2, %v3474_v12  ;;  %3318 = vmatpush3.msra.mxu0 %v3072_v28 }
 0x9f4   : > { %3315 = vmatmul.mubr.msk.f32.vlgmr.msra.gmra.mxu1 %vm1045_vm5, %v3895_v17  ;;  %3319 = vmatprep.subr.mxu0 %v3474_v12 }
 0x9f5   : > { %3328 = vmatprep.subr.mxu1 %v3474_v12  ;;  %3320 = vmatpush3.msra.mxu0 %v3071_v30 }
 0x9f6   : > { %3329 = vmatpush3.msra.mxu1 %v3077_v31  ;;  %3321 = vmatprep.subr.mxu0 %v3474_v12  ;;  %v2244_v31 = vand.u32 127, %v767_v0 }
 0x9f7   : > { %3330 = vmatprep.subr.mxu1 %v3474_v12  ;;  %3322 = vmatpush3.msra.mxu0 %v3070_v32 }
 0x9f8   : > { %3331 = vmatpush3.msra.mxu1 %v3076_v34  ;;  %3323 = vmatprep.subr.mxu0 %v3474_v12 }
 0x9f9   : > { %3332 = vmatprep.subr.mxu1 %v3474_v12  ;;  %3324 = vmatpush3.msra.mxu0 %v3069_v35 }
 0x9fa   : > { %3325 = vmatprep.mubr.msk.f32.mxu0 %vm3475_vm2, %v3474_v12  ;;  %3333 = vmatpush3.msra.mxu1 %v3075_v36 }
 0x9fb   : > { %3326 = vmatmul.mubr.msk.f32.vlgmr.msra.gmra.mxu0 %vm1045_vm5, %v2425_v37  ;;  %3334 = vmatprep.subr.mxu1 %v3474_v12 }
 0x9fc   : > { %3339 = vmatprep.subr.mxu0 %v3474_v12  ;;  %3335 = vmatpush3.msra.mxu1 %v3074_v38 }
 0x9fd   : > { %3336 = vmatprep.mubr.msk.f32.mxu1 %vm3475_vm2, %v3474_v12  ;;  %3340 = vmatpush3.msra.mxu0 %v3082_v39 }
 0x9fe   : > { %3337 = vmatmul.mubr.msk.f32.vlgmr.msra.gmra.mxu1 %vm1045_vm5, %v2504_v40  ;;  %3341 = vmatprep.subr.mxu0 %v3474_v12 }
 0x9ff   : > { %3350 = vmatprep.subr.mxu1 %v3474_v12  ;;  %3342 = vmatpush3.msra.mxu0 %v3081_v41 }
 0xa00   : > { %3351 = vmatpush3.msra.mxu1 %v3087_v33  ;;  %3343 = vmatprep.subr.mxu0 %v3474_v12  ;;  %v3477_v33 = vmov 1  }
 0xa01   : > { %3352 = vmatprep.subr.mxu1 %v3474_v12  ;;  %3344 = vmatpush3.msra.mxu0 %v3080_v43  ;;  %v3478_v43 = vmov 2  }
 0xa02   : > { %3353 = vmatpush3.msra.mxu1 %v3086_v44  ;;  %3345 = vmatprep.subr.mxu0 %v3474_v12 }
 0xa03   : > { %3354 = vmatprep.subr.mxu1 %v3474_v12  ;;  %3346 = vmatpush3.msra.mxu0 %v3079_v21 }
 0xa04   : > { %3347 = vmatprep.mubr.msk.f32.mxu0 %vm3475_vm2, %v3474_v12  ;;  %3355 = vmatpush3.msra.mxu1 %v3085_v57 }
 0xa05   : > { %3348 = vmatmul.mubr.msk.f32.vlgmr.msra.gmra.mxu0 %vm1045_vm5, %v2583_v25  ;;  %3356 = vmatprep.subr.mxu1 %v3474_v12 }
 0xa06   : > { %3361 = vmatprep.subr.mxu0 %v3474_v12  ;;  %3357 = vmatpush3.msra.mxu1 %v3084_v56 }
 0xa07   : > { %3358 = vmatprep.mubr.msk.f32.mxu1 %vm3475_vm2, %v3474_v12  ;;  %3362 = vmatpush3.msra.mxu0 %v3092_v29  ;;  %v3479_v29 = vmov 3  }
 0xa08   : > { %3359 = vmatmul.mubr.msk.f32.vlgmr.msra.gmra.mxu1 %vm1045_vm5, %v2662_v45  ;;  %3363 = vmatprep.subr.mxu0 %v3474_v12  ;;  %v3480_v45 = vmov 4  }
 0xa09   : > { %3372 = vmatprep.subr.mxu1 %v3474_v12  ;;  %3364 = vmatpush3.msra.mxu0 %v3091_v46 }
 0xa0a   : > { %3373 = vmatpush3.msra.mxu1 %v3097_v23  ;;  %3365 = vmatprep.subr.mxu0 %v3474_v12 }
 0xa0b   : > { %3374 = vmatprep.subr.mxu1 %v3474_v12  ;;  %3366 = vmatpush3.msra.mxu0 %v3090_v47 }
 0xa0c   : > { %3375 = vmatpush3.msra.mxu1 %v3096_v48  ;;  %3367 = vmatprep.subr.mxu0 %v3474_v12 }
 0xa0d   : > { %3376 = vmatprep.subr.mxu1 %v3474_v12  ;;  %3368 = vmatpush3.msra.mxu0 %v3089_v49 }
 0xa0e   : > { %3369 = vmatprep.mubr.msk.f32.mxu0 %vm3475_vm2, %v3474_v12  ;;  %3377 = vmatpush3.msra.mxu1 %v3095_v50 }
 0xa0f   : > { %3370 = vmatmul.mubr.msk.f32.vlgmr.msra.gmra.mxu0 %vm1045_vm5, %v2741_v51  ;;  %3378 = vmatprep.subr.mxu1 %v3474_v12 }
 0xa10   : > { %3379 = vmatpush3.msra.mxu1 %v3094_v52  ;;  %3380 = vmatprep.mubr.msk.f32.mxu1 %vm3475_vm2, %v3474_v12 }
 0xa11   : > { %3381 = vmatmul.mubr.msk.f32.vlgmr.msra.gmra.mxu1 %vm1045_vm5, %v2820_v53  ;;  %3404 = vset.pattern.permute.xlu0 %v3477_v33 }
 0xa12   : > { %3405 = vset.pattern.permute.xlu1 %v3478_v43 }
 0xaa9   : > { %v2153_v55 = vpop.f32.mrf.mxu0 }
 0xaaa   : > { %v2157_v58 = vadd.f32 %v2153_v55, %v2079_v54 }
 0xaab   : > { %v3283_v59 = vpop.f32.mrf.mxu0  ;;  %v2232_v60 = vpop.f32.mrf.mxu1 }
 0xaac   : > { %v2236_v62 = vadd.f32 %v2232_v60, %v2157_v58 }
 0xaad   : > { %v3294_v63 = vpop.f32.mrf.mxu1 }
 0xaae   : > { %v2238_v1 = vadd.f32 %v2237_v61, %v2236_v62 }
 0xab0   : > { %v2240_v2 = vsel %vm2239_vm8, %v2238_v1, -inf }
 0xab1   : > { %v2344_v3 = vpop.f32.mrf.mxu0  ;;  %2241 = vmax.xlane.f32.xlu0 %v2240_v2 }
 0xab3   : > { %v3305_v4 = vpop.f32.mrf.mxu0 }
 0xab4   : > { %v2416_v5 = vpop.f32.mrf.mxu1 }
 0xab5   : > { %v2417_v42 = vadd.f32 %v2416_v5, %v2344_v3 }
 0xab6   : > { %v3316_v6 = vpop.f32.mrf.mxu1 }
 0xabb   : > { %v2494_v7 = vpop.f32.mrf.mxu0 }
 0xabc   : > { %v2498_v26 = vadd.f32 %v2494_v7, %v2417_v42 }
 0xabd   : > { %v3327_v8 = vpop.f32.mrf.mxu0 }
 0xabe   : > { %v2573_v10 = vpop.f32.mrf.mxu1 }
 0xabf   : > { %v2577_v11 = vadd.f32 %v2573_v10, %v2498_v26 }
 0xac0   : > { %v3338_v13 = vpop.f32.mrf.mxu1 }
 0xac5   : > { %v2652_v14 = vpop.f32.mrf.mxu0 }
 0xac6   : > { %v2656_v15 = vadd.f32 %v2652_v14, %v2577_v11 }
 0xac7   : > { %v3349_v16 = vpop.f32.mrf.mxu0 }
 0xac8   : > { %v2731_v17 = vpop.f32.mrf.mxu1 }
 0xac9   : > { %v2735_v18 = vadd.f32 %v2731_v17, %v2656_v15 }
 0xaca   : > { %v3360_v19 = vpop.f32.mrf.mxu1 }
 0xacf   : > { %v2810_v20 = vpop.f32.mrf.mxu0 }
 0xad0   : > { %v2814_v22 = vadd.f32 %v2810_v20, %v2735_v18 }
 0xad1   : > { %v3371_v24 = vpop.f32.mrf.mxu0  ;;  %v2889_v27 = vpop.f32.mrf.mxu1 }
 0xad2   : > { %v2893_v28 = vadd.f32 %v2889_v27, %v2814_v22 }
 0xad3   : > { %v3382_v30 = vpop.f32.mrf.mxu1 }
 0xb3a   : > { %v2242_v32 = vpop.xlane.xlu0 %2241 }
 0xb3b   : > { %vm2245_vm9 = vcmp.ge.f32.partialorder %v2238_v1, %v2242_v32 }
 0xb3c   : > { %v2246_v34 = vsel %vm2245_vm9, %v2244_v31, 5 }
 0xb3d   : > { %v2247_v35 = vsel %vm2239_vm8, %v2246_v34, 2147483647 }
 0xb3e   : > { %v2249_v36 = vshra.s32 %v2247_v35, 16  ;;  %v2248_v38 = vand.u32 65535, %v2247_v35 }
 0xb40   : > { %v2251_v37 = vcvt.s32.f32 %v2249_v36  ;;  %v2250_v40 = vcvt.s32.f32 %v2248_v38 }
 0xb42   : > { %2252 = vmin.xlane.f32.xlu0 %v2251_v37 }
 0xbcb   : > { %v2253_v39 = vpop.xlane.xlu0 %2252 }
 0xbcc   : > { %vm2254_vm10 = vcmp.eq.f32.partialorder %v2251_v37, %v2253_v39  ;;  %v2259_v44 = vcvt.f32.s32 %v2253_v39 }
 0xbcd   : > { %v2255_v41 = vsel %vm2254_vm10, %v2250_v40, inf }
 0xbce   : > { %2256 = vmin.xlane.f32.xlu0 %v2255_v41  ;;  %v2260_v21 = vshll.u32 %v2259_v44, 16 }
 0xc57   : > { %v2257_v0 = vpop.xlane.xlu0 %2256 }
 0xc58   : > { %v2258_v57 = vcvt.f32.s32 %v2257_v0 }
 0xc5a   : > { %v2261_v25 = vadd.s32 %v2260_v21, %v2258_v57 }
 0xc5c   : > { %vm2262_vm11 = vcmp.eq.s32.totalorder %v2244_v31, %v2261_v25 }
 0xc5d   : > { %v3062_v56 = vsel %vm2262_vm11, 1.0, %v3474_v12 }
 0xc5e   : > { %2912 = vperm.xlu1 %3405, %v3062_v56   ;;  %2902 = vperm.xlu0 %3404, %v3062_v56  }
 0xc62   : > { %3406 = vset.pattern.permute.xlu1 %v3479_v29  ;;  %3409 = vset.pattern.permute.xlu0 %v3480_v45 }
 0xc63   : > { %2922 = vperm.xlu1 %3406, %v3062_v56  }
 0xc67   : > { %3407 = vset.pattern.permute.xlu1 %v3480_v45 }
 0xc68   : > { %2932 = vperm.xlu1 %3407, %v3062_v56  }
 0xc6c   : > { %3408 = vset.pattern.permute.xlu1 %v3476_v9 }
 0xc6d   : > { %2896 = vperm.xlu1 %3408, %v3062_v56  }
 0xcd9   : > { %v2913_v46 = vpop.permute.xlu1 %2912  ;;  %v2903_v23 = vpop.permute.xlu0 %2902 }
 0xcda   : > { %v2915_v47 = vmul.f32 %v2913_v46, %v2893_v28  ;;  %v2905_v48 = vmul.f32 %v2903_v23, %v2893_v28 }
 0xcdc   : > { %2917 = vrot.lane.b32.xlu1 %v2915_v47, %s3481_s28  ;;  %2907 = vrot.lane.b32.xlu0 %v2905_v48, %s3482_s2 }
 0xcde   : > { %v2923_v12 = vpop.permute.xlu1 %2922 }
 0xcdf   : > { %v2925_v49 = vmul.f32 %v2923_v12, %v2893_v28 }
 0xce1   : > { %2927 = vrot.lane.b32.xlu0 %v2925_v49, %s3483_s29 }
 0xce3   : > { %v2933_v50 = vpop.permute.xlu1 %2932 }
 0xce4   : > { %v2935_v51 = vmul.f32 %v2933_v50, %v2893_v28 }
 0xce6   : > { %2937 = vrot.lane.b32.xlu1 %v2935_v51, %s3484_s0 }
 0xce8   : > { %v2897_v52 = vpop.permute.xlu1 %2896 }
 0xce9   : > { %v2899_v53 = vmul.f32 %v2897_v52, %v2893_v28 }
 0xd4e   : > { %v2908_v9 = vpop.permute.xlu0 %2907  ;;  %v2918_v55 = vpop.permute.xlu1 %2917 }
 0xd4f   : > { %v2910_v54 = vadd.f32 %v2908_v9, %v2899_v53 }
 0xd51   : > { %v2920_v58 = vadd.f32 %v2918_v55, %v2910_v54 }
 0xd53   : > { %v2928_v59 = vpop.permute.xlu0 %2927 }
 0xd54   : > { %v2930_v60 = vadd.f32 %v2928_v59, %v2920_v58 }
 0xd58   : > { %v2938_v61 = vpop.permute.xlu1 %2937 }
 0xd59   : > { %v2940_v62 = vadd.f32 %v2938_v61, %v2930_v60 }
 0xd5b   : > { %v2942_v63 = vsel %vm2941_vm12, %v2940_v62, -inf }
 0xd5c   : > { %2943 = vmax.xlane.f32.xlu0 %v2942_v63 }
 0xde5   : > { %v2944_v1 = vpop.xlane.xlu0 %2943 }
 0xde6   : > { %v2945_v2 = vsub.f32 %v2940_v62, %v2944_v1 }
 0xde8   : > { %v2946_v3 = vmul.f32 1.442695, %v2945_v2 }
 0xdea   : > { %3462 = vpow2.f32 %v2946_v3 }
 0xdf7   : > { %v3463_v4 = vpop.eup %3462 }
 0xdf8   : > { %v2948_v5 = vsel %vm2941_vm12, %v3463_v4, 0.0 }
 0xdf9   : > { %2949 = vadd.xlane.f32.xlu1 %v2948_v5 }
 0xe82   : > { %v2950_v42 = vpop.xlane.xlu1 %2949 }
 0xe83   : > { %3464 = vrcp.f32 %v2950_v42 }
 0xe90   : > { %v3465_v6 = vpop.eup %3464 }
 0xe91   : > { %v2952_v7 = vmul.f32 %v3465_v6, %v3463_v4 }
 0xe93   : > { %2953 = vst.msk [vmem:[%s764_s3] sm:$0x1] %vm2941_vm12, %v2952_v7 }
 0xe94 PF: > { %s34_s5 = sadd.s32 1, %s3472_s5  }
 0xe95   : > { %p31_p4 = scmp.ge.s32.totalorder %s34_s5, 4  }
 0xe97   :  { %33 = sbr.rel (!%p31_p4) target bundleno = 10 (0xa), region = 160 }

</bundles_post_ra>
